<compile_context>
chip_gen: v7x
topology: tpu7x:2x2x1
jax: 0.10.0
libtpu: 0.0.40
codegen_flags: <defaults>
</compile_context>

<pallas_src>
import functools
import math

import jax
import jax.numpy as jnp
from jax import lax
from jax.experimental import pallas as pl
from jax.experimental.pallas import tpu as pltpu


def _lstm_mlp_kernel(x_ref, wih0_ref, whh0_ref, b0_ref,
                     wih1_ref, whh1_ref, b1_ref,
                     wfc1_ref, bfc1_ref, wfc2_ref, bfc2_ref,
                     wo_ref, bo_ref, out_ref, hs_ref,
                     *, seq_len, hidden):
    """2-layer LSTM recurrence + time-batched MLP head, all resident in VMEM."""
    f32 = jnp.float32
    H = hidden
    T = seq_len
    B = x_ref.shape[0]

    # ---- hoisted loads / broadcasts (kept out of the unrolled time loop) ----
    x = x_ref[...]                                    # (B, F)
    whh0 = whh0_ref[...]                              # (H, 4H)
    wih1 = wih1_ref[...]                              # (H, 4H)
    whh1 = whh1_ref[...]                              # (H, 4H)
    b1 = jnp.broadcast_to(b1_ref[...], (B, 4 * H))    # pre-broadcast once

    # Layer-0 input projection is constant over time (the sequence is a repeat).
    xproj0 = jnp.dot(x, wih0_ref[...], preferred_element_type=f32) + b0_ref[...]

    def lstm_cell(gates, c_prev):
        # Activations over the whole (B, 4H) vreg: one sigmoid + one tanh pass,
        # then slice i/f/o from the sigmoid result and g from the tanh result.
        sig = jax.nn.sigmoid(gates)
        th = jnp.tanh(gates)
        c = sig[:, H:2 * H] * c_prev + sig[:, 0:H] * th[:, 2 * H:3 * H]
        h = sig[:, 3 * H:4 * H] * jnp.tanh(c)
        return h, c

    # ---- peeled t = 0: h/c are zero -> both recurrent matmuls are skipped ----
    zero_bh = jnp.zeros((B, H), f32)
    h0, c0 = lstm_cell(xproj0, zero_bh)
    h1, c1 = lstm_cell(jnp.dot(h0, wih1, preferred_element_type=f32) + b1, zero_bh)
    hs_ref[0:B, :] = h1                               # time-major stash

    # ---- remaining timesteps (T is small & static -> fully unrolled) ----
    # NOTE: the [h0, h1] @ [wih1; whh1] single-dot fusion is intentionally skipped:
    # it needs a lane concat at a 32-lane (non-128-aligned) offset and buys at most
    # one MXU push at M=2; two small dots are kept for compile safety.
    # TODO(synk): switch to lax.fori_loop(..., unroll=...) carrying (h0,c0,h1,c1)
    # if seq_len grows well beyond ~32 (full unroll inflates code size/live ranges).
    for t in range(1, T):
        gates0 = xproj0 + jnp.dot(h0, whh0, preferred_element_type=f32)
        h0, c0 = lstm_cell(gates0, c0)
        gates1 = (jnp.dot(h0, wih1, preferred_element_type=f32)
                  + jnp.dot(h1, whh1, preferred_element_type=f32) + b1)
        h1, c1 = lstm_cell(gates1, c1)
        hs_ref[t * B:(t + 1) * B, :] = h1             # static-offset row-block store

    # ---- MLP head batched over all timesteps: M = T*B instead of T tiny matmuls ----
    hs = hs_ref[...]                                  # (T*B, H), rows ordered (t, b)
    y1 = jnp.maximum(
        jnp.dot(hs, wfc1_ref[...], preferred_element_type=f32) + bfc1_ref[...], 0.0)
    y2 = jnp.maximum(
        jnp.dot(y1, wfc2_ref[...], preferred_element_type=f32) + bfc2_ref[...], 0.0)
    # wo/bo arrive pre-scaled by 0.5, so this is already predictions * 0.5.
    pred_half = jnp.dot(y2, wo_ref[...], preferred_element_type=f32) + bo_ref[...]

    # Linear path: start == end == x[:, :2] (repeated sequence) -> the linspace is
    # constant over time; pre-scale by 0.5 for the blend.
    lp_half = x[:, 0:2] * 0.5                         # (B, 2)
    # Cheap epilogue: T tiny row-block stores, all off the recurrence critical path.
    for t in range(T):
        out_ref[t * B:(t + 1) * B, :] = pred_half[t * B:(t + 1) * B, :] + lp_half


def mouse_movement_lstm_forward(x, params, *, seq_len, hidden):
    """Wrapper: flatten input, call the Pallas kernel, return batch-first (B, T, O)."""
    B = x.shape[0]
    T = seq_len
    x_flat = x.reshape(B, -1).astype(jnp.float32)     # x.view(batch, -1)
    O = params["wo_t"].shape[1]

    # Fold the `predictions * 0.5` blend scale into the output-layer weights
    # (constant fold on tiny weights, outside the kernel).
    wo_half = params["wo_t"] * 0.5
    bo_half = params["b_out"] * 0.5

    vmem = pl.BlockSpec(memory_space=pltpu.MemorySpace.VMEM)
    args = (x_flat,
            params["wih0_t"], params["whh0_t"], params["b0"],
            params["wih1_t"], params["whh1_t"], params["b1"],
            params["w1_t"], params["b_fc1"],
            params["w2_t"], params["b_fc2"],
            wo_half, bo_half)

    # TODO(synk): if B grows, add a batch-tiled grid with
    # dimension_semantics=("parallel",) so v7x's second TensorCore is used.
    out_2d = pl.pallas_call(
        functools.partial(_lstm_mlp_kernel, seq_len=T, hidden=hidden),
        out_shape=jax.ShapeDtypeStruct((T * B, O), jnp.float32),
        in_specs=[vmem] * len(args),
        out_specs=vmem,
        scratch_shapes=[pltpu.VMEM((T * B, hidden), jnp.float32)],
    )(*args)
    # Kernel rows are time-major (t, b) -> reshape/transpose to (B, T, O).
    return out_2d.reshape(T, B, O).transpose(1, 0, 2)


def init_params(key, input_size, hidden, output_size):
    """Deterministic PyTorch-style uniform init; weights pre-transposed to [in, out]."""
    H = hidden
    ks = jax.random.split(key, 14)

    def u(k, shape, bound):
        return jax.random.uniform(k, shape, jnp.float32, -bound, bound)

    b_lstm = 1.0 / math.sqrt(H)
    # LSTM layer 0: weight_ih (4H, F), weight_hh (4H, H), biases (4H,)
    wih0 = u(ks[0], (4 * H, input_size), b_lstm)
    whh0 = u(ks[1], (4 * H, H), b_lstm)
    bih0 = u(ks[2], (4 * H,), b_lstm)
    bhh0 = u(ks[3], (4 * H,), b_lstm)
    # LSTM layer 1
    wih1 = u(ks[4], (4 * H, H), b_lstm)
    whh1 = u(ks[5], (4 * H, H), b_lstm)
    bih1 = u(ks[6], (4 * H,), b_lstm)
    bhh1 = u(ks[7], (4 * H,), b_lstm)
    # fc1: (2H, H), fc2: (H, 2H), output: (O, H)
    w1 = u(ks[8], (2 * H, H), 1.0 / math.sqrt(H))
    bf1 = u(ks[9], (2 * H,), 1.0 / math.sqrt(H))
    w2 = u(ks[10], (H, 2 * H), 1.0 / math.sqrt(2 * H))
    bf2 = u(ks[11], (H,), 1.0 / math.sqrt(2 * H))
    wo = u(ks[12], (output_size, H), 1.0 / math.sqrt(H))
    bo = u(ks[13], (output_size,), 1.0 / math.sqrt(H))

    return {
        "wih0_t": wih0.T, "whh0_t": whh0.T, "b0": (bih0 + bhh0)[None, :],
        "wih1_t": wih1.T, "whh1_t": whh1.T, "b1": (bih1 + bhh1)[None, :],
        "w1_t": w1.T, "b_fc1": bf1[None, :],
        "w2_t": w2.T, "b_fc2": bf2[None, :],
        "wo_t": wo.T, "b_out": bo[None, :],
    }


def reference_forward(x, params, seq_len, hidden):
    """Pure-JAX reference of the PyTorch forward (eval mode)."""
    B = x.shape[0]
    H = hidden
    x_flat = x.reshape(B, -1)
    xs = jnp.broadcast_to(x_flat[:, None, :], (B, seq_len, x_flat.shape[1]))
    hp = lambda a, b: jnp.dot(a, b, precision=jax.lax.Precision.HIGHEST)

    def lstm_layer(inp, wih_t, whh_t, b):
        def step(carry, x_t):
            h, c = carry
            g = hp(x_t, wih_t) + hp(h, whh_t) + b
            i = jax.nn.sigmoid(g[:, :H])
            f = jax.nn.sigmoid(g[:, H:2 * H])
            gg = jnp.tanh(g[:, 2 * H:3 * H])
            o = jax.nn.sigmoid(g[:, 3 * H:])
            c = f * c + i * gg
            h = o * jnp.tanh(c)
            return (h, c), h
        init = (jnp.zeros((B, H), jnp.float32), jnp.zeros((B, H), jnp.float32))
        _, hs = lax.scan(step, init, jnp.transpose(inp, (1, 0, 2)))
        return jnp.transpose(hs, (1, 0, 2))

    h0 = lstm_layer(xs, params["wih0_t"], params["whh0_t"], params["b0"])
    h1 = lstm_layer(h0, params["wih1_t"], params["whh1_t"], params["b1"])
    y1 = jnp.maximum(hp(h1, params["w1_t"]) + params["b_fc1"], 0.0)
    y2 = jnp.maximum(hp(y1, params["w2_t"]) + params["b_fc2"], 0.0)
    pred = hp(y2, params["wo_t"]) + params["b_out"]

    start = xs[:, 0, :2]
    end = xs[:, -1, :2]
    frac = (jnp.arange(seq_len, dtype=jnp.float32) / float(max(seq_len - 1, 1)))[None, :, None]
    lp = start[:, None, :] + (end - start)[:, None, :] * frac
    return pred * 0.5 + lp * 0.5


if __name__ == "__main__":
    # Module hyper-parameters (small, consistent with the PyTorch module):
    #   x: (batch=2, 2, 2)  ->  flattened input_size = 4
    #   hidden_layer_size = 32, num_layers = 2, output_size = 2, sequence_length = 8
    B = 2
    n_points, point_dim = 2, 2
    input_size = n_points * point_dim
    hidden = 32
    output_size = 2
    seq_len = 8

    key = jax.random.PRNGKey(0)
    kx, kp = jax.random.split(key)
    x = jax.random.uniform(kx, (B, n_points, point_dim), jnp.float32)
    params = init_params(kp, input_size, hidden, output_size)

    out = mouse_movement_lstm_forward(x, params, seq_len=seq_len, hidden=hidden)
    out = jax.block_until_ready(out)

    ref = reference_forward(x, params, seq_len, hidden)
    assert out.shape == (B, seq_len, output_size)
    assert bool(jnp.all(jnp.isfinite(out)))
    assert bool(jnp.allclose(out, ref, rtol=1e-2, atol=1e-2))
    print("KERNEL_OK")
</pallas_src>

<mosaic_0001>
module attributes {stable_mosaic.version = 11 : i64} {
  func.func @_lstm_mlp_kernel(%arg0: memref<2x4xf32, #tpu.memory_space<vmem>>, %arg1: memref<4x128xf32, #tpu.memory_space<vmem>>, %arg2: memref<32x128xf32, #tpu.memory_space<vmem>>, %arg3: memref<1x128xf32, #tpu.memory_space<vmem>>, %arg4: memref<32x128xf32, #tpu.memory_space<vmem>>, %arg5: memref<32x128xf32, #tpu.memory_space<vmem>>, %arg6: memref<1x128xf32, #tpu.memory_space<vmem>>, %arg7: memref<32x64xf32, #tpu.memory_space<vmem>>, %arg8: memref<1x64xf32, #tpu.memory_space<vmem>>, %arg9: memref<64x32xf32, #tpu.memory_space<vmem>>, %arg10: memref<1x32xf32, #tpu.memory_space<vmem>>, %arg11: memref<32x2xf32, #tpu.memory_space<vmem>>, %arg12: memref<1x2xf32, #tpu.memory_space<vmem>>, %arg13: memref<16x2xf32, #tpu.memory_space<vmem>>, %arg14: memref<16x32xf32, #tpu.memory_space<vmem>>) attributes {dimension_semantics = [], scalar_prefetch = 0 : i64, scratch_operands = 1 : i64, tpu.core_type = #tpu.core_type<tc>} {
    %c0 = arith.constant 0 : index
    %c0_0 = arith.constant 0 : index
    %0 = vector.load %arg0[%c0, %c0_0] : memref<2x4xf32, #tpu.memory_space<vmem>>, vector<2x4xf32>
    %c0_1 = arith.constant 0 : index
    %c0_2 = arith.constant 0 : index
    %1 = vector.load %arg2[%c0_1, %c0_2] : memref<32x128xf32, #tpu.memory_space<vmem>>, vector<32x128xf32>
    %c0_3 = arith.constant 0 : index
    %c0_4 = arith.constant 0 : index
    %2 = vector.load %arg4[%c0_3, %c0_4] : memref<32x128xf32, #tpu.memory_space<vmem>>, vector<32x128xf32>
    %c0_5 = arith.constant 0 : index
    %c0_6 = arith.constant 0 : index
    %3 = vector.load %arg5[%c0_5, %c0_6] : memref<32x128xf32, #tpu.memory_space<vmem>>, vector<32x128xf32>
    %c0_7 = arith.constant 0 : index
    %c0_8 = arith.constant 0 : index
    %4 = vector.load %arg6[%c0_7, %c0_8] : memref<1x128xf32, #tpu.memory_space<vmem>>, vector<1x128xf32>
    %5 = vector.shape_cast %4 : vector<1x128xf32> to vector<1x128xf32>
    %6 = vector.broadcast %5 : vector<1x128xf32> to vector<2x128xf32>
    %c0_9 = arith.constant 0 : index
    %c0_10 = arith.constant 0 : index
    %7 = vector.load %arg1[%c0_9, %c0_10] : memref<4x128xf32, #tpu.memory_space<vmem>>, vector<4x128xf32>
    %cst = arith.constant dense<0.000000e+00> : vector<2x128xf32>
    %8 = tpu.matmul %0, %7, %cst {dimension_numbers = #tpu.dot_dimension_numbers<[1], [0], [0], [1], [0, 0, 1, 1], [], []>} : vector<2x4xf32>, vector<4x128xf32>, vector<2x128xf32> -> vector<2x128xf32>
    %c0_11 = arith.constant 0 : index
    %c0_12 = arith.constant 0 : index
    %9 = vector.load %arg3[%c0_11, %c0_12] : memref<1x128xf32, #tpu.memory_space<vmem>>, vector<1x128xf32>
    %10 = vector.broadcast %9 : vector<1x128xf32> to vector<2x128xf32>
    %11 = arith.addf %8, %10 : vector<2x128xf32>
    %cst_13 = arith.constant 0.000000e+00 : f32
    %12 = vector.broadcast %cst_13 : f32 to vector<2x32xf32>
    %13 = arith.negf %11 : vector<2x128xf32>
    %14 = math.exp %13 : vector<2x128xf32>
    %cst_14 = arith.constant 1.000000e+00 : f32
    %15 = vector.broadcast %cst_14 : f32 to vector<2x128xf32>
    %16 = arith.addf %15, %14 : vector<2x128xf32>
    %17 = arith.divf %15, %16 : vector<2x128xf32>
    %18 = math.tanh %11 : vector<2x128xf32>
    %19 = vector.extract_strided_slice %17 {offsets = [0, 32], sizes = [2, 32], strides = [1, 1]} : vector<2x128xf32> to vector<2x32xf32>
    %20 = arith.mulf %19, %12 : vector<2x32xf32>
    %21 = vector.extract_strided_slice %17 {offsets = [0, 0], sizes = [2, 32], strides = [1, 1]} : vector<2x128xf32> to vector<2x32xf32>
    %22 = vector.extract_strided_slice %18 {offsets = [0, 64], sizes = [2, 32], strides = [1, 1]} : vector<2x128xf32> to vector<2x32xf32>
    %23 = arith.mulf %21, %22 : vector<2x32xf32>
    %24 = arith.addf %20, %23 : vector<2x32xf32>
    %25 = vector.extract_strided_slice %17 {offsets = [0, 96], sizes = [2, 32], strides = [1, 1]} : vector<2x128xf32> to vector<2x32xf32>
    %26 = math.tanh %24 : vector<2x32xf32>
    %27 = arith.mulf %25, %26 : vector<2x32xf32>
    %cst_15 = arith.constant dense<0.000000e+00> : vector<2x128xf32>
    %28 = tpu.matmul %27, %2, %cst_15 {dimension_numbers = #tpu.dot_dimension_numbers<[1], [0], [0], [1], [0, 0, 1, 1], [], []>} : vector<2x32xf32>, vector<32x128xf32>, vector<2x128xf32> -> vector<2x128xf32>
    %29 = arith.addf %28, %6 : vector<2x128xf32>
    %30 = arith.negf %29 : vector<2x128xf32>
    %31 = math.exp %30 : vector<2x128xf32>
    %cst_16 = arith.constant 1.000000e+00 : f32
    %32 = vector.broadcast %cst_16 : f32 to vector<2x128xf32>
    %33 = arith.addf %32, %31 : vector<2x128xf32>
    %34 = arith.divf %32, %33 : vector<2x128xf32>
    %35 = math.tanh %29 : vector<2x128xf32>
    %36 = vector.extract_strided_slice %34 {offsets = [0, 32], sizes = [2, 32], strides = [1, 1]} : vector<2x128xf32> to vector<2x32xf32>
    %37 = arith.mulf %36, %12 : vector<2x32xf32>
    %38 = vector.extract_strided_slice %34 {offsets = [0, 0], sizes = [2, 32], strides = [1, 1]} : vector<2x128xf32> to vector<2x32xf32>
    %39 = vector.extract_strided_slice %35 {offsets = [0, 64], sizes = [2, 32], strides = [1, 1]} : vector<2x128xf32> to vector<2x32xf32>
    %40 = arith.mulf %38, %39 : vector<2x32xf32>
    %41 = arith.addf %37, %40 : vector<2x32xf32>
    %42 = vector.extract_strided_slice %34 {offsets = [0, 96], sizes = [2, 32], strides = [1, 1]} : vector<2x128xf32> to vector<2x32xf32>
    %43 = math.tanh %41 : vector<2x32xf32>
    %44 = arith.mulf %42, %43 : vector<2x32xf32>
    %c0_17 = arith.constant 0 : index
    %c0_18 = arith.constant 0 : index
    %45 = vector.load %arg14[%c0_17, %c0_18] : memref<16x32xf32, #tpu.memory_space<vmem>>, vector<2x32xf32>
    tpu.vector_store %arg14[%c0_17, %c0_18], %44 {strides = array<i32>} : memref<16x32xf32, #tpu.memory_space<vmem>>, vector<2x32xf32>,
    %cst_19 = arith.constant dense<0.000000e+00> : vector<2x128xf32>
    %46 = tpu.matmul %27, %1, %cst_19 {dimension_numbers = #tpu.dot_dimension_numbers<[1], [0], [0], [1], [0, 0, 1, 1], [], []>} : vector<2x32xf32>, vector<32x128xf32>, vector<2x128xf32> -> vector<2x128xf32>
    %47 = arith.addf %11, %46 : vector<2x128xf32>
    %48 = arith.negf %47 : vector<2x128xf32>
    %49 = math.exp %48 : vector<2x128xf32>
    %cst_20 = arith.constant 1.000000e+00 : f32
    %50 = vector.broadcast %cst_20 : f32 to vector<2x128xf32>
    %51 = arith.addf %50, %49 : vector<2x128xf32>
    %52 = arith.divf %50, %51 : vector<2x128xf32>
    %53 = math.tanh %47 : vector<2x128xf32>
    %54 = vector.extract_strided_slice %52 {offsets = [0, 32], sizes = [2, 32], strides = [1, 1]} : vector<2x128xf32> to vector<2x32xf32>
    %55 = arith.mulf %54, %24 : vector<2x32xf32>
    %56 = vector.extract_strided_slice %52 {offsets = [0, 0], sizes = [2, 32], strides = [1, 1]} : vector<2x128xf32> to vector<2x32xf32>
    %57 = vector.extract_strided_slice %53 {offsets = [0, 64], sizes = [2, 32], strides = [1, 1]} : vector<2x128xf32> to vector<2x32xf32>
    %58 = arith.mulf %56, %57 : vector<2x32xf32>
    %59 = arith.addf %55, %58 : vector<2x32xf32>
    %60 = vector.extract_strided_slice %52 {offsets = [0, 96], sizes = [2, 32], strides = [1, 1]} : vector<2x128xf32> to vector<2x32xf32>
    %61 = math.tanh %59 : vector<2x32xf32>
    %62 = arith.mulf %60, %61 : vector<2x32xf32>
    %cst_21 = arith.constant dense<0.000000e+00> : vector<2x128xf32>
    %63 = tpu.matmul %62, %2, %cst_21 {dimension_numbers = #tpu.dot_dimension_numbers<[1], [0], [0], [1], [0, 0, 1, 1], [], []>} : vector<2x32xf32>, vector<32x128xf32>, vector<2x128xf32> -> vector<2x128xf32>
    %cst_22 = arith.constant dense<0.000000e+00> : vector<2x128xf32>
    %64 = tpu.matmul %44, %3, %cst_22 {dimension_numbers = #tpu.dot_dimension_numbers<[1], [0], [0], [1], [0, 0, 1, 1], [], []>} : vector<2x32xf32>, vector<32x128xf32>, vector<2x128xf32> -> vector<2x128xf32>
    %65 = arith.addf %63, %64 : vector<2x128xf32>
    %66 = arith.addf %65, %6 : vector<2x128xf32>
    %67 = arith.negf %66 : vector<2x128xf32>
    %68 = math.exp %67 : vector<2x128xf32>
    %cst_23 = arith.constant 1.000000e+00 : f32
    %69 = vector.broadcast %cst_23 : f32 to vector<2x128xf32>
    %70 = arith.addf %69, %68 : vector<2x128xf32>
    %71 = arith.divf %69, %70 : vector<2x128xf32>
    %72 = math.tanh %66 : vector<2x128xf32>
    %73 = vector.extract_strided_slice %71 {offsets = [0, 32], sizes = [2, 32], strides = [1, 1]} : vector<2x128xf32> to vector<2x32xf32>
    %74 = arith.mulf %73, %41 : vector<2x32xf32>
    %75 = vector.extract_strided_slice %71 {offsets = [0, 0], sizes = [2, 32], strides = [1, 1]} : vector<2x128xf32> to vector<2x32xf32>
    %76 = vector.extract_strided_slice %72 {offsets = [0, 64], sizes = [2, 32], strides = [1, 1]} : vector<2x128xf32> to vector<2x32xf32>
    %77 = arith.mulf %75, %76 : vector<2x32xf32>
    %78 = arith.addf %74, %77 : vector<2x32xf32>
    %79 = vector.extract_strided_slice %71 {offsets = [0, 96], sizes = [2, 32], strides = [1, 1]} : vector<2x128xf32> to vector<2x32xf32>
    %80 = math.tanh %78 : vector<2x32xf32>
    %81 = arith.mulf %79, %80 : vector<2x32xf32>
    %c2 = arith.constant 2 : index
    %c0_24 = arith.constant 0 : index
    %82 = vector.load %arg14[%c2, %c0_24] : memref<16x32xf32, #tpu.memory_space<vmem>>, vector<2x32xf32>
    tpu.vector_store %arg14[%c2, %c0_24], %81 {strides = array<i32>} : memref<16x32xf32, #tpu.memory_space<vmem>>, vector<2x32xf32>,
    %cst_25 = arith.constant dense<0.000000e+00> : vector<2x128xf32>
    %83 = tpu.matmul %62, %1, %cst_25 {dimension_numbers = #tpu.dot_dimension_numbers<[1], [0], [0], [1], [0, 0, 1, 1], [], []>} : vector<2x32xf32>, vector<32x128xf32>, vector<2x128xf32> -> vector<2x128xf32>
    %84 = arith.addf %11, %83 : vector<2x128xf32>
    %85 = arith.negf %84 : vector<2x128xf32>
    %86 = math.exp %85 : vector<2x128xf32>
    %cst_26 = arith.constant 1.000000e+00 : f32
    %87 = vector.broadcast %cst_26 : f32 to vector<2x128xf32>
    %88 = arith.addf %87, %86 : vector<2x128xf32>
    %89 = arith.divf %87, %88 : vector<2x128xf32>
    %90 = math.tanh %84 : vector<2x128xf32>
    %91 = vector.extract_strided_slice %89 {offsets = [0, 32], sizes = [2, 32], strides = [1, 1]} : vector<2x128xf32> to vector<2x32xf32>
    %92 = arith.mulf %91, %59 : vector<2x32xf32>
    %93 = vector.extract_strided_slice %89 {offsets = [0, 0], sizes = [2, 32], strides = [1, 1]} : vector<2x128xf32> to vector<2x32xf32>
    %94 = vector.extract_strided_slice %90 {offsets = [0, 64], sizes = [2, 32], strides = [1, 1]} : vector<2x128xf32> to vector<2x32xf32>
    %95 = arith.mulf %93, %94 : vector<2x32xf32>
    %96 = arith.addf %92, %95 : vector<2x32xf32>
    %97 = vector.extract_strided_slice %89 {offsets = [0, 96], sizes = [2, 32], strides = [1, 1]} : vector<2x128xf32> to vector<2x32xf32>
    %98 = math.tanh %96 : vector<2x32xf32>
    %99 = arith.mulf %97, %98 : vector<2x32xf32>
    %cst_27 = arith.constant dense<0.000000e+00> : vector<2x128xf32>
    %100 = tpu.matmul %99, %2, %cst_27 {dimension_numbers = #tpu.dot_dimension_numbers<[1], [0], [0], [1], [0, 0, 1, 1], [], []>} : vector<2x32xf32>, vector<32x128xf32>, vector<2x128xf32> -> vector<2x128xf32>
    %cst_28 = arith.constant dense<0.000000e+00> : vector<2x128xf32>
    %101 = tpu.matmul %81, %3, %cst_28 {dimension_numbers = #tpu.dot_dimension_numbers<[1], [0], [0], [1], [0, 0, 1, 1], [], []>} : vector<2x32xf32>, vector<32x128xf32>, vector<2x128xf32> -> vector<2x128xf32>
    %102 = arith.addf %100, %101 : vector<2x128xf32>
    %103 = arith.addf %102, %6 : vector<2x128xf32>
    %104 = arith.negf %103 : vector<2x128xf32>
    %105 = math.exp %104 : vector<2x128xf32>
    %cst_29 = arith.constant 1.000000e+00 : f32
    %106 = vector.broadcast %cst_29 : f32 to vector<2x128xf32>
    %107 = arith.addf %106, %105 : vector<2x128xf32>
    %108 = arith.divf %106, %107 : vector<2x128xf32>
    %109 = math.tanh %103 : vector<2x128xf32>
    %110 = vector.extract_strided_slice %108 {offsets = [0, 32], sizes = [2, 32], strides = [1, 1]} : vector<2x128xf32> to vector<2x32xf32>
    %111 = arith.mulf %110, %78 : vector<2x32xf32>
    %112 = vector.extract_strided_slice %108 {offsets = [0, 0], sizes = [2, 32], strides = [1, 1]} : vector<2x128xf32> to vector<2x32xf32>
    %113 = vector.extract_strided_slice %109 {offsets = [0, 64], sizes = [2, 32], strides = [1, 1]} : vector<2x128xf32> to vector<2x32xf32>
    %114 = arith.mulf %112, %113 : vector<2x32xf32>
    %115 = arith.addf %111, %114 : vector<2x32xf32>
    %116 = vector.extract_strided_slice %108 {offsets = [0, 96], sizes = [2, 32], strides = [1, 1]} : vector<2x128xf32> to vector<2x32xf32>
    %117 = math.tanh %115 : vector<2x32xf32>
    %118 = arith.mulf %116, %117 : vector<2x32xf32>
    %c4 = arith.constant 4 : index
    %c0_30 = arith.constant 0 : index
    %119 = vector.load %arg14[%c4, %c0_30] : memref<16x32xf32, #tpu.memory_space<vmem>>, vector<2x32xf32>
    tpu.vector_store %arg14[%c4, %c0_30], %118 {strides = array<i32>} : memref<16x32xf32, #tpu.memory_space<vmem>>, vector<2x32xf32>,
    %cst_31 = arith.constant dense<0.000000e+00> : vector<2x128xf32>
    %120 = tpu.matmul %99, %1, %cst_31 {dimension_numbers = #tpu.dot_dimension_numbers<[1], [0], [0], [1], [0, 0, 1, 1], [], []>} : vector<2x32xf32>, vector<32x128xf32>, vector<2x128xf32> -> vector<2x128xf32>
    %121 = arith.addf %11, %120 : vector<2x128xf32>
    %122 = arith.negf %121 : vector<2x128xf32>
    %123 = math.exp %122 : vector<2x128xf32>
    %cst_32 = arith.constant 1.000000e+00 : f32
    %124 = vector.broadcast %cst_32 : f32 to vector<2x128xf32>
    %125 = arith.addf %124, %123 : vector<2x128xf32>
    %126 = arith.divf %124, %125 : vector<2x128xf32>
    %127 = math.tanh %121 : vector<2x128xf32>
    %128 = vector.extract_strided_slice %126 {offsets = [0, 32], sizes = [2, 32], strides = [1, 1]} : vector<2x128xf32> to vector<2x32xf32>
    %129 = arith.mulf %128, %96 : vector<2x32xf32>
    %130 = vector.extract_strided_slice %126 {offsets = [0, 0], sizes = [2, 32], strides = [1, 1]} : vector<2x128xf32> to vector<2x32xf32>
    %131 = vector.extract_strided_slice %127 {offsets = [0, 64], sizes = [2, 32], strides = [1, 1]} : vector<2x128xf32> to vector<2x32xf32>
    %132 = arith.mulf %130, %131 : vector<2x32xf32>
    %133 = arith.addf %129, %132 : vector<2x32xf32>
    %134 = vector.extract_strided_slice %126 {offsets = [0, 96], sizes = [2, 32], strides = [1, 1]} : vector<2x128xf32> to vector<2x32xf32>
    %135 = math.tanh %133 : vector<2x32xf32>
    %136 = arith.mulf %134, %135 : vector<2x32xf32>
    %cst_33 = arith.constant dense<0.000000e+00> : vector<2x128xf32>
    %137 = tpu.matmul %136, %2, %cst_33 {dimension_numbers = #tpu.dot_dimension_numbers<[1], [0], [0], [1], [0, 0, 1, 1], [], []>} : vector<2x32xf32>, vector<32x128xf32>, vector<2x128xf32> -> vector<2x128xf32>
    %cst_34 = arith.constant dense<0.000000e+00> : vector<2x128xf32>
    %138 = tpu.matmul %118, %3, %cst_34 {dimension_numbers = #tpu.dot_dimension_numbers<[1], [0], [0], [1], [0, 0, 1, 1], [], []>} : vector<2x32xf32>, vector<32x128xf32>, vector<2x128xf32> -> vector<2x128xf32>
    %139 = arith.addf %137, %138 : vector<2x128xf32>
    %140 = arith.addf %139, %6 : vector<2x128xf32>
    %141 = arith.negf %140 : vector<2x128xf32>
    %142 = math.exp %141 : vector<2x128xf32>
    %cst_35 = arith.constant 1.000000e+00 : f32
    %143 = vector.broadcast %cst_35 : f32 to vector<2x128xf32>
    %144 = arith.addf %143, %142 : vector<2x128xf32>
    %145 = arith.divf %143, %144 : vector<2x128xf32>
    %146 = math.tanh %140 : vector<2x128xf32>
    %147 = vector.extract_strided_slice %145 {offsets = [0, 32], sizes = [2, 32], strides = [1, 1]} : vector<2x128xf32> to vector<2x32xf32>
    %148 = arith.mulf %147, %115 : vector<2x32xf32>
    %149 = vector.extract_strided_slice %145 {offsets = [0, 0], sizes = [2, 32], strides = [1, 1]} : vector<2x128xf32> to vector<2x32xf32>
    %150 = vector.extract_strided_slice %146 {offsets = [0, 64], sizes = [2, 32], strides = [1, 1]} : vector<2x128xf32> to vector<2x32xf32>
    %151 = arith.mulf %149, %150 : vector<2x32xf32>
    %152 = arith.addf %148, %151 : vector<2x32xf32>
    %153 = vector.extract_strided_slice %145 {offsets = [0, 96], sizes = [2, 32], strides = [1, 1]} : vector<2x128xf32> to vector<2x32xf32>
    %154 = math.tanh %152 : vector<2x32xf32>
    %155 = arith.mulf %153, %154 : vector<2x32xf32>
    %c6 = arith.constant 6 : index
    %c0_36 = arith.constant 0 : index
    %156 = vector.load %arg14[%c6, %c0_36] : memref<16x32xf32, #tpu.memory_space<vmem>>, vector<2x32xf32>
    tpu.vector_store %arg14[%c6, %c0_36], %155 {strides = array<i32>} : memref<16x32xf32, #tpu.memory_space<vmem>>, vector<2x32xf32>,
    %cst_37 = arith.constant dense<0.000000e+00> : vector<2x128xf32>
    %157 = tpu.matmul %136, %1, %cst_37 {dimension_numbers = #tpu.dot_dimension_numbers<[1], [0], [0], [1], [0, 0, 1, 1], [], []>} : vector<2x32xf32>, vector<32x128xf32>, vector<2x128xf32> -> vector<2x128xf32>
    %158 = arith.addf %11, %157 : vector<2x128xf32>
    %159 = arith.negf %158 : vector<2x128xf32>
    %160 = math.exp %159 : vector<2x128xf32>
    %cst_38 = arith.constant 1.000000e+00 : f32
    %161 = vector.broadcast %cst_38 : f32 to vector<2x128xf32>
    %162 = arith.addf %161, %160 : vector<2x128xf32>
    %163 = arith.divf %161, %162 : vector<2x128xf32>
    %164 = math.tanh %158 : vector<2x128xf32>
    %165 = vector.extract_strided_slice %163 {offsets = [0, 32], sizes = [2, 32], strides = [1, 1]} : vector<2x128xf32> to vector<2x32xf32>
    %166 = arith.mulf %165, %133 : vector<2x32xf32>
    %167 = vector.extract_strided_slice %163 {offsets = [0, 0], sizes = [2, 32], strides = [1, 1]} : vector<2x128xf32> to vector<2x32xf32>
    %168 = vector.extract_strided_slice %164 {offsets = [0, 64], sizes = [2, 32], strides = [1, 1]} : vector<2x128xf32> to vector<2x32xf32>
    %169 = arith.mulf %167, %168 : vector<2x32xf32>
    %170 = arith.addf %166, %169 : vector<2x32xf32>
    %171 = vector.extract_strided_slice %163 {offsets = [0, 96], sizes = [2, 32], strides = [1, 1]} : vector<2x128xf32> to vector<2x32xf32>
    %172 = math.tanh %170 : vector<2x32xf32>
    %173 = arith.mulf %171, %172 : vector<2x32xf32>
    %cst_39 = arith.constant dense<0.000000e+00> : vector<2x128xf32>
    %174 = tpu.matmul %173, %2, %cst_39 {dimension_numbers = #tpu.dot_dimension_numbers<[1], [0], [0], [1], [0, 0, 1, 1], [], []>} : vector<2x32xf32>, vector<32x128xf32>, vector<2x128xf32> -> vector<2x128xf32>
    %cst_40 = arith.constant dense<0.000000e+00> : vector<2x128xf32>
    %175 = tpu.matmul %155, %3, %cst_40 {dimension_numbers = #tpu.dot_dimension_numbers<[1], [0], [0], [1], [0, 0, 1, 1], [], []>} : vector<2x32xf32>, vector<32x128xf32>, vector<2x128xf32> -> vector<2x128xf32>
    %176 = arith.addf %174, %175 : vector<2x128xf32>
    %177 = arith.addf %176, %6 : vector<2x128xf32>
    %178 = arith.negf %177 : vector<2x128xf32>
    %179 = math.exp %178 : vector<2x128xf32>
    %cst_41 = arith.constant 1.000000e+00 : f32
    %180 = vector.broadcast %cst_41 : f32 to vector<2x128xf32>
    %181 = arith.addf %180, %179 : vector<2x128xf32>
    %182 = arith.divf %180, %181 : vector<2x128xf32>
    %183 = math.tanh %177 : vector<2x128xf32>
    %184 = vector.extract_strided_slice %182 {offsets = [0, 32], sizes = [2, 32], strides = [1, 1]} : vector<2x128xf32> to vector<2x32xf32>
    %185 = arith.mulf %184, %152 : vector<2x32xf32>
    %186 = vector.extract_strided_slice %182 {offsets = [0, 0], sizes = [2, 32], strides = [1, 1]} : vector<2x128xf32> to vector<2x32xf32>
    %187 = vector.extract_strided_slice %183 {offsets = [0, 64], sizes = [2, 32], strides = [1, 1]} : vector<2x128xf32> to vector<2x32xf32>
    %188 = arith.mulf %186, %187 : vector<2x32xf32>
    %189 = arith.addf %185, %188 : vector<2x32xf32>
    %190 = vector.extract_strided_slice %182 {offsets = [0, 96], sizes = [2, 32], strides = [1, 1]} : vector<2x128xf32> to vector<2x32xf32>
    %191 = math.tanh %189 : vector<2x32xf32>
    %192 = arith.mulf %190, %191 : vector<2x32xf32>
    %c8 = arith.constant 8 : index
    %c0_42 = arith.constant 0 : index
    %193 = vector.load %arg14[%c8, %c0_42] : memref<16x32xf32, #tpu.memory_space<vmem>>, vector<2x32xf32>
    tpu.vector_store %arg14[%c8, %c0_42], %192 {strides = array<i32>} : memref<16x32xf32, #tpu.memory_space<vmem>>, vector<2x32xf32>,
    %cst_43 = arith.constant dense<0.000000e+00> : vector<2x128xf32>
    %194 = tpu.matmul %173, %1, %cst_43 {dimension_numbers = #tpu.dot_dimension_numbers<[1], [0], [0], [1], [0, 0, 1, 1], [], []>} : vector<2x32xf32>, vector<32x128xf32>, vector<2x128xf32> -> vector<2x128xf32>
    %195 = arith.addf %11, %194 : vector<2x128xf32>
    %196 = arith.negf %195 : vector<2x128xf32>
    %197 = math.exp %196 : vector<2x128xf32>
    %cst_44 = arith.constant 1.000000e+00 : f32
    %198 = vector.broadcast %cst_44 : f32 to vector<2x128xf32>
    %199 = arith.addf %198, %197 : vector<2x128xf32>
    %200 = arith.divf %198, %199 : vector<2x128xf32>
    %201 = math.tanh %195 : vector<2x128xf32>
    %202 = vector.extract_strided_slice %200 {offsets = [0, 32], sizes = [2, 32], strides = [1, 1]} : vector<2x128xf32> to vector<2x32xf32>
    %203 = arith.mulf %202, %170 : vector<2x32xf32>
    %204 = vector.extract_strided_slice %200 {offsets = [0, 0], sizes = [2, 32], strides = [1, 1]} : vector<2x128xf32> to vector<2x32xf32>
    %205 = vector.extract_strided_slice %201 {offsets = [0, 64], sizes = [2, 32], strides = [1, 1]} : vector<2x128xf32> to vector<2x32xf32>
    %206 = arith.mulf %204, %205 : vector<2x32xf32>
    %207 = arith.addf %203, %206 : vector<2x32xf32>
    %208 = vector.extract_strided_slice %200 {offsets = [0, 96], sizes = [2, 32], strides = [1, 1]} : vector<2x128xf32> to vector<2x32xf32>
    %209 = math.tanh %207 : vector<2x32xf32>
    %210 = arith.mulf %208, %209 : vector<2x32xf32>
    %cst_45 = arith.constant dense<0.000000e+00> : vector<2x128xf32>
    %211 = tpu.matmul %210, %2, %cst_45 {dimension_numbers = #tpu.dot_dimension_numbers<[1], [0], [0], [1], [0, 0, 1, 1], [], []>} : vector<2x32xf32>, vector<32x128xf32>, vector<2x128xf32> -> vector<2x128xf32>
    %cst_46 = arith.constant dense<0.000000e+00> : vector<2x128xf32>
    %212 = tpu.matmul %192, %3, %cst_46 {dimension_numbers = #tpu.dot_dimension_numbers<[1], [0], [0], [1], [0, 0, 1, 1], [], []>} : vector<2x32xf32>, vector<32x128xf32>, vector<2x128xf32> -> vector<2x128xf32>
    %213 = arith.addf %211, %212 : vector<2x128xf32>
    %214 = arith.addf %213, %6 : vector<2x128xf32>
    %215 = arith.negf %214 : vector<2x128xf32>
    %216 = math.exp %215 : vector<2x128xf32>
    %cst_47 = arith.constant 1.000000e+00 : f32
    %217 = vector.broadcast %cst_47 : f32 to vector<2x128xf32>
    %218 = arith.addf %217, %216 : vector<2x128xf32>
    %219 = arith.divf %217, %218 : vector<2x128xf32>
    %220 = math.tanh %214 : vector<2x128xf32>
    %221 = vector.extract_strided_slice %219 {offsets = [0, 32], sizes = [2, 32], strides = [1, 1]} : vector<2x128xf32> to vector<2x32xf32>
    %222 = arith.mulf %221, %189 : vector<2x32xf32>
    %223 = vector.extract_strided_slice %219 {offsets = [0, 0], sizes = [2, 32], strides = [1, 1]} : vector<2x128xf32> to vector<2x32xf32>
    %224 = vector.extract_strided_slice %220 {offsets = [0, 64], sizes = [2, 32], strides = [1, 1]} : vector<2x128xf32> to vector<2x32xf32>
    %225 = arith.mulf %223, %224 : vector<2x32xf32>
    %226 = arith.addf %222, %225 : vector<2x32xf32>
    %227 = vector.extract_strided_slice %219 {offsets = [0, 96], sizes = [2, 32], strides = [1, 1]} : vector<2x128xf32> to vector<2x32xf32>
    %228 = math.tanh %226 : vector<2x32xf32>
    %229 = arith.mulf %227, %228 : vector<2x32xf32>
    %c10 = arith.constant 10 : index
    %c0_48 = arith.constant 0 : index
    %230 = vector.load %arg14[%c10, %c0_48] : memref<16x32xf32, #tpu.memory_space<vmem>>, vector<2x32xf32>
    tpu.vector_store %arg14[%c10, %c0_48], %229 {strides = array<i32>} : memref<16x32xf32, #tpu.memory_space<vmem>>, vector<2x32xf32>,
    %cst_49 = arith.constant dense<0.000000e+00> : vector<2x128xf32>
    %231 = tpu.matmul %210, %1, %cst_49 {dimension_numbers = #tpu.dot_dimension_numbers<[1], [0], [0], [1], [0, 0, 1, 1], [], []>} : vector<2x32xf32>, vector<32x128xf32>, vector<2x128xf32> -> vector<2x128xf32>
    %232 = arith.addf %11, %231 : vector<2x128xf32>
    %233 = arith.negf %232 : vector<2x128xf32>
    %234 = math.exp %233 : vector<2x128xf32>
    %cst_50 = arith.constant 1.000000e+00 : f32
    %235 = vector.broadcast %cst_50 : f32 to vector<2x128xf32>
    %236 = arith.addf %235, %234 : vector<2x128xf32>
    %237 = arith.divf %235, %236 : vector<2x128xf32>
    %238 = math.tanh %232 : vector<2x128xf32>
    %239 = vector.extract_strided_slice %237 {offsets = [0, 32], sizes = [2, 32], strides = [1, 1]} : vector<2x128xf32> to vector<2x32xf32>
    %240 = arith.mulf %239, %207 : vector<2x32xf32>
    %241 = vector.extract_strided_slice %237 {offsets = [0, 0], sizes = [2, 32], strides = [1, 1]} : vector<2x128xf32> to vector<2x32xf32>
    %242 = vector.extract_strided_slice %238 {offsets = [0, 64], sizes = [2, 32], strides = [1, 1]} : vector<2x128xf32> to vector<2x32xf32>
    %243 = arith.mulf %241, %242 : vector<2x32xf32>
    %244 = arith.addf %240, %243 : vector<2x32xf32>
    %245 = vector.extract_strided_slice %237 {offsets = [0, 96], sizes = [2, 32], strides = [1, 1]} : vector<2x128xf32> to vector<2x32xf32>
    %246 = math.tanh %244 : vector<2x32xf32>
    %247 = arith.mulf %245, %246 : vector<2x32xf32>
    %cst_51 = arith.constant dense<0.000000e+00> : vector<2x128xf32>
    %248 = tpu.matmul %247, %2, %cst_51 {dimension_numbers = #tpu.dot_dimension_numbers<[1], [0], [0], [1], [0, 0, 1, 1], [], []>} : vector<2x32xf32>, vector<32x128xf32>, vector<2x128xf32> -> vector<2x128xf32>
    %cst_52 = arith.constant dense<0.000000e+00> : vector<2x128xf32>
    %249 = tpu.matmul %229, %3, %cst_52 {dimension_numbers = #tpu.dot_dimension_numbers<[1], [0], [0], [1], [0, 0, 1, 1], [], []>} : vector<2x32xf32>, vector<32x128xf32>, vector<2x128xf32> -> vector<2x128xf32>
    %250 = arith.addf %248, %249 : vector<2x128xf32>
    %251 = arith.addf %250, %6 : vector<2x128xf32>
    %252 = arith.negf %251 : vector<2x128xf32>
    %253 = math.exp %252 : vector<2x128xf32>
    %cst_53 = arith.constant 1.000000e+00 : f32
    %254 = vector.broadcast %cst_53 : f32 to vector<2x128xf32>
    %255 = arith.addf %254, %253 : vector<2x128xf32>
    %256 = arith.divf %254, %255 : vector<2x128xf32>
    %257 = math.tanh %251 : vector<2x128xf32>
    %258 = vector.extract_strided_slice %256 {offsets = [0, 32], sizes = [2, 32], strides = [1, 1]} : vector<2x128xf32> to vector<2x32xf32>
    %259 = arith.mulf %258, %226 : vector<2x32xf32>
    %260 = vector.extract_strided_slice %256 {offsets = [0, 0], sizes = [2, 32], strides = [1, 1]} : vector<2x128xf32> to vector<2x32xf32>
    %261 = vector.extract_strided_slice %257 {offsets = [0, 64], sizes = [2, 32], strides = [1, 1]} : vector<2x128xf32> to vector<2x32xf32>
    %262 = arith.mulf %260, %261 : vector<2x32xf32>
    %263 = arith.addf %259, %262 : vector<2x32xf32>
    %264 = vector.extract_strided_slice %256 {offsets = [0, 96], sizes = [2, 32], strides = [1, 1]} : vector<2x128xf32> to vector<2x32xf32>
    %265 = math.tanh %263 : vector<2x32xf32>
    %266 = arith.mulf %264, %265 : vector<2x32xf32>
    %c12 = arith.constant 12 : index
    %c0_54 = arith.constant 0 : index
    %267 = vector.load %arg14[%c12, %c0_54] : memref<16x32xf32, #tpu.memory_space<vmem>>, vector<2x32xf32>
    tpu.vector_store %arg14[%c12, %c0_54], %266 {strides = array<i32>} : memref<16x32xf32, #tpu.memory_space<vmem>>, vector<2x32xf32>,
    %cst_55 = arith.constant dense<0.000000e+00> : vector<2x128xf32>
    %268 = tpu.matmul %247, %1, %cst_55 {dimension_numbers = #tpu.dot_dimension_numbers<[1], [0], [0], [1], [0, 0, 1, 1], [], []>} : vector<2x32xf32>, vector<32x128xf32>, vector<2x128xf32> -> vector<2x128xf32>
    %269 = arith.addf %11, %268 : vector<2x128xf32>
    %270 = arith.negf %269 : vector<2x128xf32>
    %271 = math.exp %270 : vector<2x128xf32>
    %cst_56 = arith.constant 1.000000e+00 : f32
    %272 = vector.broadcast %cst_56 : f32 to vector<2x128xf32>
    %273 = arith.addf %272, %271 : vector<2x128xf32>
    %274 = arith.divf %272, %273 : vector<2x128xf32>
    %275 = math.tanh %269 : vector<2x128xf32>
    %276 = vector.extract_strided_slice %274 {offsets = [0, 32], sizes = [2, 32], strides = [1, 1]} : vector<2x128xf32> to vector<2x32xf32>
    %277 = arith.mulf %276, %244 : vector<2x32xf32>
    %278 = vector.extract_strided_slice %274 {offsets = [0, 0], sizes = [2, 32], strides = [1, 1]} : vector<2x128xf32> to vector<2x32xf32>
    %279 = vector.extract_strided_slice %275 {offsets = [0, 64], sizes = [2, 32], strides = [1, 1]} : vector<2x128xf32> to vector<2x32xf32>
    %280 = arith.mulf %278, %279 : vector<2x32xf32>
    %281 = arith.addf %277, %280 : vector<2x32xf32>
    %282 = vector.extract_strided_slice %274 {offsets = [0, 96], sizes = [2, 32], strides = [1, 1]} : vector<2x128xf32> to vector<2x32xf32>
    %283 = math.tanh %281 : vector<2x32xf32>
    %284 = arith.mulf %282, %283 : vector<2x32xf32>
    %cst_57 = arith.constant dense<0.000000e+00> : vector<2x128xf32>
    %285 = tpu.matmul %284, %2, %cst_57 {dimension_numbers = #tpu.dot_dimension_numbers<[1], [0], [0], [1], [0, 0, 1, 1], [], []>} : vector<2x32xf32>, vector<32x128xf32>, vector<2x128xf32> -> vector<2x128xf32>
    %cst_58 = arith.constant dense<0.000000e+00> : vector<2x128xf32>
    %286 = tpu.matmul %266, %3, %cst_58 {dimension_numbers = #tpu.dot_dimension_numbers<[1], [0], [0], [1], [0, 0, 1, 1], [], []>} : vector<2x32xf32>, vector<32x128xf32>, vector<2x128xf32> -> vector<2x128xf32>
    %287 = arith.addf %285, %286 : vector<2x128xf32>
    %288 = arith.addf %287, %6 : vector<2x128xf32>
    %289 = arith.negf %288 : vector<2x128xf32>
    %290 = math.exp %289 : vector<2x128xf32>
    %cst_59 = arith.constant 1.000000e+00 : f32
    %291 = vector.broadcast %cst_59 : f32 to vector<2x128xf32>
    %292 = arith.addf %291, %290 : vector<2x128xf32>
    %293 = arith.divf %291, %292 : vector<2x128xf32>
    %294 = math.tanh %288 : vector<2x128xf32>
    %295 = vector.extract_strided_slice %293 {offsets = [0, 32], sizes = [2, 32], strides = [1, 1]} : vector<2x128xf32> to vector<2x32xf32>
    %296 = arith.mulf %295, %263 : vector<2x32xf32>
    %297 = vector.extract_strided_slice %293 {offsets = [0, 0], sizes = [2, 32], strides = [1, 1]} : vector<2x128xf32> to vector<2x32xf32>
    %298 = vector.extract_strided_slice %294 {offsets = [0, 64], sizes = [2, 32], strides = [1, 1]} : vector<2x128xf32> to vector<2x32xf32>
    %299 = arith.mulf %297, %298 : vector<2x32xf32>
    %300 = arith.addf %296, %299 : vector<2x32xf32>
    %301 = vector.extract_strided_slice %293 {offsets = [0, 96], sizes = [2, 32], strides = [1, 1]} : vector<2x128xf32> to vector<2x32xf32>
    %302 = math.tanh %300 : vector<2x32xf32>
    %303 = arith.mulf %301, %302 : vector<2x32xf32>
    %c14 = arith.constant 14 : index
    %c0_60 = arith.constant 0 : index
    %304 = vector.load %arg14[%c14, %c0_60] : memref<16x32xf32, #tpu.memory_space<vmem>>, vector<2x32xf32>
    tpu.vector_store %arg14[%c14, %c0_60], %303 {strides = array<i32>} : memref<16x32xf32, #tpu.memory_space<vmem>>, vector<2x32xf32>,
    %c0_61 = arith.constant 0 : index
    %c0_62 = arith.constant 0 : index
    %305 = vector.load %arg14[%c0_61, %c0_62] : memref<16x32xf32, #tpu.memory_space<vmem>>, vector<16x32xf32>
    %c0_63 = arith.constant 0 : index
    %c0_64 = arith.constant 0 : index
    %306 = vector.load %arg7[%c0_63, %c0_64] : memref<32x64xf32, #tpu.memory_space<vmem>>, vector<32x64xf32>
    %cst_65 = arith.constant dense<0.000000e+00> : vector<16x64xf32>
    %307 = tpu.matmul %305, %306, %cst_65 {dimension_numbers = #tpu.dot_dimension_numbers<[1], [0], [0], [1], [0, 0, 1, 1], [], []>} : vector<16x32xf32>, vector<32x64xf32>, vector<16x64xf32> -> vector<16x64xf32>
    %c0_66 = arith.constant 0 : index
    %c0_67 = arith.constant 0 : index
    %308 = vector.load %arg8[%c0_66, %c0_67] : memref<1x64xf32, #tpu.memory_space<vmem>>, vector<1x64xf32>
    %309 = vector.broadcast %308 : vector<1x64xf32> to vector<16x64xf32>
    %310 = arith.addf %307, %309 : vector<16x64xf32>
    %cst_68 = arith.constant 0.000000e+00 : f32
    %311 = vector.broadcast %cst_68 : f32 to vector<16x64xf32>
    %312 = arith.maximumf %310, %311 : vector<16x64xf32>
    %c0_69 = arith.constant 0 : index
    %c0_70 = arith.constant 0 : index
    %313 = vector.load %arg9[%c0_69, %c0_70] : memref<64x32xf32, #tpu.memory_space<vmem>>, vector<64x32xf32>
    %cst_71 = arith.constant dense<0.000000e+00> : vector<16x32xf32>
    %314 = tpu.matmul %312, %313, %cst_71 {dimension_numbers = #tpu.dot_dimension_numbers<[1], [0], [0], [1], [0, 0, 1, 1], [], []>} : vector<16x64xf32>, vector<64x32xf32>, vector<16x32xf32> -> vector<16x32xf32>
    %c0_72 = arith.constant 0 : index
    %c0_73 = arith.constant 0 : index
    %315 = vector.load %arg10[%c0_72, %c0_73] : memref<1x32xf32, #tpu.memory_space<vmem>>, vector<1x32xf32>
    %316 = vector.broadcast %315 : vector<1x32xf32> to vector<16x32xf32>
    %317 = arith.addf %314, %316 : vector<16x32xf32>
    %cst_74 = arith.constant 0.000000e+00 : f32
    %318 = vector.broadcast %cst_74 : f32 to vector<16x32xf32>
    %319 = arith.maximumf %317, %318 : vector<16x32xf32>
    %c0_75 = arith.constant 0 : index
    %c0_76 = arith.constant 0 : index
    %320 = vector.load %arg11[%c0_75, %c0_76] : memref<32x2xf32, #tpu.memory_space<vmem>>, vector<32x2xf32>
    %cst_77 = arith.constant dense<0.000000e+00> : vector<16x2xf32>
    %321 = tpu.matmul %319, %320, %cst_77 {dimension_numbers = #tpu.dot_dimension_numbers<[1], [0], [0], [1], [0, 0, 1, 1], [], []>} : vector<16x32xf32>, vector<32x2xf32>, vector<16x2xf32> -> vector<16x2xf32>
    %c0_78 = arith.constant 0 : index
    %c0_79 = arith.constant 0 : index
    %322 = vector.load %arg12[%c0_78, %c0_79] : memref<1x2xf32, #tpu.memory_space<vmem>>, vector<1x2xf32>
    %323 = vector.broadcast %322 : vector<1x2xf32> to vector<16x2xf32>
    %324 = arith.addf %321, %323 : vector<16x2xf32>
    %325 = vector.extract_strided_slice %0 {offsets = [0, 0], sizes = [2, 2], strides = [1, 1]} : vector<2x4xf32> to vector<2x2xf32>
    %cst_80 = arith.constant 5.000000e-01 : f32
    %326 = vector.broadcast %cst_80 : f32 to vector<2x2xf32>
    %327 = arith.mulf %325, %326 : vector<2x2xf32>
    %328 = vector.extract_strided_slice %324 {offsets = [0, 0], sizes = [2, 2], strides = [1, 1]} : vector<16x2xf32> to vector<2x2xf32>
    %329 = arith.addf %328, %327 : vector<2x2xf32>
    %c0_81 = arith.constant 0 : index
    %c0_82 = arith.constant 0 : index
    %330 = vector.load %arg13[%c0_81, %c0_82] : memref<16x2xf32, #tpu.memory_space<vmem>>, vector<2x2xf32>
    tpu.vector_store %arg13[%c0_81, %c0_82], %329 {strides = array<i32>} : memref<16x2xf32, #tpu.memory_space<vmem>>, vector<2x2xf32>,
    %331 = vector.extract_strided_slice %324 {offsets = [2, 0], sizes = [2, 2], strides = [1, 1]} : vector<16x2xf32> to vector<2x2xf32>
    %332 = arith.addf %331, %327 : vector<2x2xf32>
    %c2_83 = arith.constant 2 : index
    %c0_84 = arith.constant 0 : index
    %333 = vector.load %arg13[%c2_83, %c0_84] : memref<16x2xf32, #tpu.memory_space<vmem>>, vector<2x2xf32>
    tpu.vector_store %arg13[%c2_83, %c0_84], %332 {strides = array<i32>} : memref<16x2xf32, #tpu.memory_space<vmem>>, vector<2x2xf32>,
    %334 = vector.extract_strided_slice %324 {offsets = [4, 0], sizes = [2, 2], strides = [1, 1]} : vector<16x2xf32> to vector<2x2xf32>
    %335 = arith.addf %334, %327 : vector<2x2xf32>
    %c4_85 = arith.constant 4 : index
    %c0_86 = arith.constant 0 : index
    %336 = vector.load %arg13[%c4_85, %c0_86] : memref<16x2xf32, #tpu.memory_space<vmem>>, vector<2x2xf32>
    tpu.vector_store %arg13[%c4_85, %c0_86], %335 {strides = array<i32>} : memref<16x2xf32, #tpu.memory_space<vmem>>, vector<2x2xf32>,
    %337 = vector.extract_strided_slice %324 {offsets = [6, 0], sizes = [2, 2], strides = [1, 1]} : vector<16x2xf32> to vector<2x2xf32>
    %338 = arith.addf %337, %327 : vector<2x2xf32>
    %c6_87 = arith.constant 6 : index
    %c0_88 = arith.constant 0 : index
    %339 = vector.load %arg13[%c6_87, %c0_88] : memref<16x2xf32, #tpu.memory_space<vmem>>, vector<2x2xf32>
    tpu.vector_store %arg13[%c6_87, %c0_88], %338 {strides = array<i32>} : memref<16x2xf32, #tpu.memory_space<vmem>>, vector<2x2xf32>,
    %340 = vector.extract_strided_slice %324 {offsets = [8, 0], sizes = [2, 2], strides = [1, 1]} : vector<16x2xf32> to vector<2x2xf32>
    %341 = arith.addf %340, %327 : vector<2x2xf32>
    %c8_89 = arith.constant 8 : index
    %c0_90 = arith.constant 0 : index
    %342 = vector.load %arg13[%c8_89, %c0_90] : memref<16x2xf32, #tpu.memory_space<vmem>>, vector<2x2xf32>
    tpu.vector_store %arg13[%c8_89, %c0_90], %341 {strides = array<i32>} : memref<16x2xf32, #tpu.memory_space<vmem>>, vector<2x2xf32>,
    %343 = vector.extract_strided_slice %324 {offsets = [10, 0], sizes = [2, 2], strides = [1, 1]} : vector<16x2xf32> to vector<2x2xf32>
    %344 = arith.addf %343, %327 : vector<2x2xf32>
    %c10_91 = arith.constant 10 : index
    %c0_92 = arith.constant 0 : index
    %345 = vector.load %arg13[%c10_91, %c0_92] : memref<16x2xf32, #tpu.memory_space<vmem>>, vector<2x2xf32>
    tpu.vector_store %arg13[%c10_91, %c0_92], %344 {strides = array<i32>} : memref<16x2xf32, #tpu.memory_space<vmem>>, vector<2x2xf32>,
    %346 = vector.extract_strided_slice %324 {offsets = [12, 0], sizes = [2, 2], strides = [1, 1]} : vector<16x2xf32> to vector<2x2xf32>
    %347 = arith.addf %346, %327 : vector<2x2xf32>
    %c12_93 = arith.constant 12 : index
    %c0_94 = arith.constant 0 : index
    %348 = vector.load %arg13[%c12_93, %c0_94] : memref<16x2xf32, #tpu.memory_space<vmem>>, vector<2x2xf32>
    tpu.vector_store %arg13[%c12_93, %c0_94], %347 {strides = array<i32>} : memref<16x2xf32, #tpu.memory_space<vmem>>, vector<2x2xf32>,
    %349 = vector.extract_strided_slice %324 {offsets = [14, 0], sizes = [2, 2], strides = [1, 1]} : vector<16x2xf32> to vector<2x2xf32>
    %350 = arith.addf %349, %327 : vector<2x2xf32>
    %c14_95 = arith.constant 14 : index
    %c0_96 = arith.constant 0 : index
    %351 = vector.load %arg13[%c14_95, %c0_96] : memref<16x2xf32, #tpu.memory_space<vmem>>, vector<2x2xf32>
    tpu.vector_store %arg13[%c14_95, %c0_96], %350 {strides = array<i32>} : memref<16x2xf32, #tpu.memory_space<vmem>>, vector<2x2xf32>,
    return
  }
}

</mosaic_0001>

<bundles_post_ra>
// kernel: tpu_custom_call.1
= control target key start
LH: loop header
LB: loop body
LE: loop exit
PB: predicated region body
PF: predicated region fallthrough
CT: control target
= control target key end

     0   :  { %18 = vsyncpa [#allocation4], 0  ;;  %s4036_s0 = inlined_call_operand.hbm [shape: f32[2,4], index: 0, kind: input, shape index: {}]   ;;  %s4037_s1 = inlined_call_operand.hbm [shape: f32[4,128], index: 1, kind: input, shape index: {}]   ;;  %s4038_s2 = inlined_call_operand.vmem [shape: f32[32,128], index: 2, kind: input, shape index: {}]   ;;  %s4039_s3 = inlined_call_operand.hbm [shape: f32[1,128], index: 3, kind: input, shape index: {}]   ;;  %s4040_s4 = inlined_call_operand.vmem [shape: f32[32,128], index: 4, kind: input, shape index: {}]   ;;  %s4041_s5 = inlined_call_operand.vmem [shape: f32[32,128], index: 5, kind: input, shape index: {}]   ;;  %s4042_s6 = inlined_call_operand.hbm [shape: f32[1,128], index: 6, kind: input, shape index: {}]   ;;  %s4043_s7 = inlined_call_operand.vmem [shape: f32[32,64], index: 7, kind: input, shape index: {}]   ;;  %s4044_s8 = inlined_call_operand.hbm [shape: f32[1,64], index: 8, kind: input, shape index: {}]   ;;  %s4045_s9 = inlined_call_operand.vmem [shape: f32[64,32], index: 9, kind: input, shape index: {}]   ;;  %s4046_s10 = inlined_call_operand.vmem [shape: f32[1,32], index: 10, kind: input, shape index: {}]   ;;  %s4047_s11 = inlined_call_operand.vmem [shape: f32[32,2], index: 11, kind: input, shape index: {}]   ;;  %s4048_s12 = inlined_call_operand.vmem [shape: f32[1,2], index: 12, kind: input, shape index: {}]   ;;  %s4049_s13 = inlined_call_operand.vmem [shape: f32[16,2], index: 13, kind: output, shape index: {}]  }
   0x1   :  { %19 = vsyncpa [#allocation6], 0 }
   0x2   :  { %20 = vsyncpa [#allocation9], 0  ;;  %s3456_s25 = smov [#allocation5]   ;;  %s3457_s27 = smov [#allocation8]  }
   0x3   :  { %s37_s26 = sshll.u32 %s3456_s25, 4  ;;  %s63_s28 = sshll.u32 %s3457_s27, 4  ;;  %s38_s26 = int_to_ptr.vmem [resolvable:$true] %s37_s26  ;;  %s64_s28 = int_to_ptr.vmem [resolvable:$true] %s63_s28 }
   0x4   :  { %s3340_s14 = scalar_lea.hbm %s4037_s1, 64 }
   0x5   :  { %p3341_p0 = scmp.ne.s32.totalorder %s4037_s1, %s3340_s14  ;;  %p3344_p1 = scmp.lt.u32.totalorder %s3340_s14, %s4037_s1 }
   0x7   :  { %p3346_p2 = pnand %p3344_p1, %p3341_p0 }
   0x9   :  { %3349 = shalt.err (!%p3346_p2)
}
   0xa   :  { %s3350_s19 = scalar_lea.vmem %s38_s26, 64  ;;  %p3355_p4 = scmp.lt.s32.totalorder %s38_s26, %s38_s26 }
   0xb   :  { %p3351_p3 = scmp.ne.s32.totalorder %s38_s26, %s3350_s19  ;;  %p3356_p5 = scmp.lt.s32.totalorder %s3350_s19, %s3350_s19 }
   0xd   :  { %p3357_p6 = por %p3356_p5, %p3355_p4 }
   0xf   :  { %p3358_p7 = pnand %p3357_p6, %p3351_p3 }
  0x11   :  { %3361 = shalt.err (!%p3358_p7)
}
  0x12   :  { %40 = dma.hbm_to_vmem [thread:$0]  %s4037_s1, 64, %s38_s26, [#allocation6]  }
  0x13   :  { %s3362_s24 = scalar_lea.hbm %s4042_s6, 16 }
  0x14   :  { %p3363_p8 = scmp.ne.s32.totalorder %s4042_s6, %s3362_s24  ;;  %p3366_p9 = scmp.lt.u32.totalorder %s3362_s24, %s4042_s6 }
  0x16   :  { %p3368_p10 = pnand %p3366_p9, %p3363_p8 }
  0x18   :  { %3371 = shalt.err (!%p3368_p10)
}
  0x19   :  { %s3372_s14 = scalar_lea.vmem %s64_s28, 16  ;;  %s3376_s15 = scalar_lea.vmem %s64_s28, 32 }
  0x1a   :  { %p3373_p11 = scmp.ne.s32.totalorder %s64_s28, %s3372_s14  ;;  %p3377_p12 = scmp.lt.s32.totalorder %s64_s28, %s64_s28 }
  0x1b   :  { %p3378_p13 = scmp.lt.s32.totalorder %s3376_s15, %s3372_s14 }
  0x1d   :  { %p3379_p0 = por %p3378_p13, %p3377_p12 }
  0x1f   :  { %p3380_p1 = pnand %p3379_p0, %p3373_p11 }
  0x21   :  { %3383 = shalt.err (!%p3380_p1)
}
  0x22   :  { %66 = dma.hbm_to_vmem [thread:$0]  %s4042_s6, 16, %s64_s28, [#allocation9]  }
  0x23   :  { %s3458_s16 = smov [#allocation3]   ;;  %s3459_s18 = smov [#allocation7]  }
  0x24   :  { %s27_s17 = sshll.u32 %s3458_s16, 4  ;;  %s49_s19 = sshll.u32 %s3459_s18, 4  ;;  %s28_s17 = int_to_ptr.vmem [resolvable:$true] %s27_s17  ;;  %s50_s19 = int_to_ptr.vmem [resolvable:$true] %s49_s19 }
  0x25   :  { %s3384_s22 = scalar_lea.hbm %s4036_s0, 32 }
  0x26   :  { %p3385_p2 = scmp.ne.s32.totalorder %s4036_s0, %s3384_s22  ;;  %p3388_p3 = scmp.lt.u32.totalorder %s3384_s22, %s4036_s0 }
  0x28   :  { %p3390_p4 = pnand %p3388_p3, %p3385_p2 }
  0x2a   :  { %3393 = shalt.err (!%p3390_p4)
}
  0x2b   :  { %s3394_s6 = scalar_lea.vmem %s28_s17, 32  ;;  %p3399_p6 = scmp.lt.s32.totalorder %s28_s17, %s28_s17 }
  0x2c   :  { %p3395_p5 = scmp.ne.s32.totalorder %s28_s17, %s3394_s6  ;;  %p3400_p7 = scmp.lt.s32.totalorder %s3394_s6, %s3394_s6 }
  0x2e   :  { %p3401_p8 = por %p3400_p7, %p3399_p6 }
  0x30   :  { %p3402_p9 = pnand %p3401_p8, %p3395_p5 }
  0x32   :  { %3405 = shalt.err (!%p3402_p9)
}
  0x33   :  { %30 = dma.hbm_to_vmem [thread:$0]  %s4036_s0, 32, %s28_s17, [#allocation4]  }
  0x34   :  { %s3406_s15 = scalar_lea.hbm %s4039_s3, 16 }
  0x35   :  { %p3407_p10 = scmp.ne.s32.totalorder %s4039_s3, %s3406_s15  ;;  %p3410_p11 = scmp.lt.u32.totalorder %s3406_s15, %s4039_s3 }
  0x37   :  { %p3412_p12 = pnand %p3410_p11, %p3407_p10 }
  0x39   :  { %3415 = shalt.err (!%p3412_p12)
}
  0x3a   :  { %s3416_s20 = scalar_lea.vmem %s50_s19, 16  ;;  %s3420_s21 = scalar_lea.vmem %s50_s19, 32 }
  0x3b   :  { %p3417_p13 = scmp.ne.s32.totalorder %s50_s19, %s3416_s20  ;;  %p3421_p0 = scmp.lt.s32.totalorder %s50_s19, %s50_s19 }
  0x3c   :  { %p3422_p1 = scmp.lt.s32.totalorder %s3420_s21, %s3416_s20 }
  0x3e   :  { %p3423_p2 = por %p3422_p1, %p3421_p0 }
  0x40   :  { %p3424_p3 = pnand %p3423_p2, %p3417_p13 }
  0x42   :  { %3427 = shalt.err (!%p3424_p3)
}
  0x43   :  { %52 = dma.hbm_to_vmem [thread:$0]  %s4039_s3, 16, %s50_s19, [#allocation6]  }
  0x44   :  { %s3460_s22 = smov [#allocation10]   ;;  %s3428_s27 = scalar_lea.hbm %s4044_s8, 16 }
  0x45   :  { %s75_s23 = sshll.u32 %s3460_s22, 4  ;;  %p3429_p4 = scmp.ne.s32.totalorder %s4044_s8, %s3428_s27  ;;  %s76_s23 = int_to_ptr.vmem [resolvable:$true] %s75_s23 }
  0x46   :  { %p3432_p5 = scmp.lt.u32.totalorder %s3428_s27, %s4044_s8 }
  0x48   :  { %p3434_p6 = pnand %p3432_p5, %p3429_p4 }
  0x4a   :  { %3437 = shalt.err (!%p3434_p6)
}
  0x4b   :  { %s3438_s14 = scalar_lea.vmem %s76_s23, 16  ;;  %s3442_s3 = scalar_lea.vmem %s76_s23, 32 }
  0x4c   :  { %p3439_p7 = scmp.ne.s32.totalorder %s76_s23, %s3438_s14  ;;  %p3443_p8 = scmp.lt.s32.totalorder %s76_s23, %s76_s23 }
  0x4d   :  { %p3444_p9 = scmp.lt.s32.totalorder %s3442_s3, %s3438_s14 }
  0x4f   :  { %p3445_p10 = por %p3444_p9, %p3443_p8 }
  0x51   :  { %p3446_p11 = pnand %p3445_p10, %p3439_p7 }
  0x53   :  { %3449 = shalt.err (!%p3446_p11)
}
  0x54   :  { %78 = dma.hbm_to_vmem [thread:$0]  %s4044_s8, 16, %s76_s23, [#allocation9]  }
  0x55   :  { %3450 = dma.done.wait [#allocation4], 32  }
  0x56   :  { %3451 = vsyncadd [#allocation4], 4294967264 }
  0x57   :  { %3452 = dma.done.wait [#allocation6], 80  }
  0x58   :  { %3453 = vsyncadd [#allocation6], 4294967216 }
  0x59   :  { %3454 = dma.done.wait [#allocation9], 32  }
  0x5a   :  { %3455 = vsyncadd [#allocation9], 4294967264  ;;  %v3461_v0 = vmov 0.0   ;;  %vm3462_vm0 = vmmov 0   ;;  %vm134_vm1 = vcmask 1043456   ;;  %vm130_vm2 = vcmask 31744  }
  0x5b   :  { %2749 = vmatprep.subr.mxu0 %v3461_v0  ;;  %2751 = vmatprep.mubr.msk.f32.mxu0 %vm3462_vm0, %v3461_v0  ;;  %v122_v1 = vld [vmem:[#allocation5] sm:$0xf]  ;;  %v102_v2 = vld [vmem:[#allocation3] sm:$0x3]  ;;  %v2565_v3 = vld [vmem:[#allocation7] ss:$0 sm:$0xff] }
  0x5c   :  { %2762 = vmatprep.mubr.msk.f32.mxu1 %vm3462_vm0, %v3461_v0  ;;  %2750 = vmatpush3.msk.msra.mxu0 %vm134_vm1, %v122_v1  ;;  %s3463_s8 = smov 64   ;;  %s3464_s1 = smov 32   ;;  %v107_v17 = vld [vmem:[%s4040_s4] sm:$0xff]  ;;  %v108_v18 = vld [vmem:[%s4040_s4 + $0x8] sm:$0xff]  ;;  %v3465_v20 = vmov 0.0|0.0   ;;  %v109_v23 = vld [vmem:[%s4040_s4 + $0x10] sm:$0xff] }
  0x5d   :  { %2752 = vmatmul.mubr.msk.f32.vlgmr.msra.gmra.mrb[0].mxu0 %vm130_vm2, %v102_v2  ;;  %v103_v19 = vld [vmem:[%s4038_s2] sm:$0xff]  ;;  %3037 = vmatprep.subr.bf16.mxu1 %v3465_v20  ;;  %v3623_v21 = vpack.c.bf16 %v108_v18, %v107_v17  ;;  %v104_v22 = vld [vmem:[%s4038_s2 + $0x8] sm:$0xff]  ;;  %v110_v24 = vld [vmem:[%s4040_s4 + $0x18] sm:$0xff]  ;;  %vm235_vm3 = vcmask 261120   ;;  %vm336_vm4 = vcmask 254976   ;;  %vm2353_vm5 = vcmask 523264  }
  0x5e   :  { %2773 = vmatprep.mubr.msk.f32.mxu0 %vm3462_vm0, %v3461_v0  ;;  %3043 = vmatprep.subr.bf16.mxu0 %v3465_v20  ;;  %v3634_v25 = vpack.c.bf16 %v104_v22, %v103_v19  ;;  %v105_v26 = vld [vmem:[%s4038_s2 + $0x10] sm:$0xff]  ;;  %v106_v27 = vld [vmem:[%s4038_s2 + $0x18] sm:$0xff]  ;;  %v3643_v28 = vpack.c.bf16 %v110_v24, %v109_v23  ;;  %v111_v61 = vld [vmem:[%s4041_s5] sm:$0xff]  ;;  %vm2531_vm6 = vcmask 9216   ;;  %vm2537_vm7 = vcmask 11266  }
  0x5f   :  { %3039 = vmatpush3.bf16.msra.mxu1 %v3623_v21  ;;  %v3647_v29 = vpack.c.bf16 %v106_v27, %v105_v26  ;;  %v3666_v34 = vld [vmem:[#allocation8] ss:$0 sm:$0xff]  ;;  %v112_v62 = vld [vmem:[%s4041_s5 + $0x8] sm:$0xff]  ;;  %v113_v63 = vld [vmem:[%s4041_s5 + $0x10] sm:$0xff]  ;;  %vm2542_vm8 = vcmask 13316   ;;  %vm2547_vm9 = vcmask 15366  }
  0x60   :  { %3045 = vmatpush3.bf16.msra.mxu0 %v3634_v25  ;;  %3040 = vmatprep.subr.bf16.mxu1 %v3465_v20  ;;  %v3690_v1 = vpack.c.bf16 %v112_v62, %v111_v61  ;;  %v114_v2 = vld [vmem:[%s4041_s5 + $0x18] sm:$0xff] }
  0x61   :  { %3046 = vmatprep.subr.bf16.mxu0 %v3465_v20 }
  0x63   :  { %3042 = vmatpush3.bf16.msra.mxu1 %v3643_v28 }
  0x64   :  { %3048 = vmatpush3.bf16.msra.mxu0 %v3647_v29  ;;  %3049 = vmatprep.subr.bf16.mxu1 %v3465_v20 }
  0x65   :  { %3055 = vmatprep.subr.bf16.mxu0 %v3465_v20 }
 0x130   :  { %v204_v4 = vpop.f32.mrb[0].mxu0 }
 0x131   :  { %v3603_v5 = vadd.f32 %v2565_v3, %v204_v4  ;;  %v2753_v6 = vpop.f32.mrb[1].mxu0  ;;  %v3696_v3 = vpack.c.bf16 %v114_v2, %v113_v63 }
 0x133   :  { %3211 = vtanh.f32 %v3603_v5  ;;  %v2568_v8 = vmul.f32 -1.442695, %v3603_v5 }
 0x135   :  { %3213 = vpow2.f32 %v2568_v8 }
 0x13d   :  { %v3212_v7 = vpop.eup %3211 }
 0x13e   :  { %217 = vrot.lane.b32.xlu0 %v3212_v7, %s3463_s8 }
 0x13f   :  { %v3214_v9 = vpop.eup %3213 }
 0x140   :  { %v211_v10 = vadd.f32 1.0, %v3214_v9 }
 0x142   :  { %3215 = vrcp.f32 %v211_v10 }
 0x14c   :  { %v3216_v11 = vpop.eup %3215 }
 0x14d   :  { %v215_v14 = vmul.f32 0.0, %v3216_v11 }
 0x1b0   :  { %v218_v12 = vpop.permute.xlu0 %217 }
 0x1b1   :  { %v220_v13 = vmul.f32 %v3216_v11, %v218_v12 }
 0x1b3   :  { %222 = vrot.lane.b32.xlu0 %v220_v13, %s3464_s1 }
 0x225   :  { %v223_v15 = vpop.permute.xlu0 %222 }
 0x226   :  { %v3609_v16 = vadd.f32 %v223_v15, %v215_v14 }
 0x228   :  { %3217 = vtanh.f32 %v3609_v16 }
 0x232   :  { %v3218_v30 = vpop.eup %3217 }
 0x233   :  { %228 = vrot.lane.b32.xlu1 %v3218_v30, %s3463_s8 }
 0x2a5   :  { %v229_v31 = vpop.permute.xlu1 %228 }
 0x2a6   :  { %v231_v32 = vmul.f32 %v3216_v11, %v229_v31 }
 0x2a8   :  { %233 = vrot.lane.b32.xlu1 %v231_v32, %s3464_s1 }
 0x31a   :  { %v234_v33 = vpop.permute.xlu1 %233 }
 0x31b   :  { %2763 = vmatmul.mubr.msk.f32.vlgmr.msra.gmra.mrb[0].mxu1 %vm235_vm3, %v234_v33  ;;  %2774 = vmatmul.mubr.msk.f32.vlgmr.msra.gmra.mrb[2].mxu0 %vm235_vm3, %v234_v33 }
 0x31c   :  { %3057 = vmatpush3.bf16.msra.mxu0 %v3623_v21  ;;  %2784 = vmatprep.mubr.msk.f32.mxu1 %vm3462_vm0, %v3461_v0 }
 0x31d   :  { %3058 = vmatprep.subr.bf16.mxu0 %v3465_v20  ;;  %2795 = vmatprep.mubr.msk.f32.mxu0 %vm3462_vm0, %v3461_v0 }
 0x31e   :  { %3051 = vmatpush3.bf16.msra.mxu1 %v3690_v1 }
 0x31f   :  { %3052 = vmatprep.subr.bf16.mxu1 %v3465_v20 }
 0x320   :  { %3060 = vmatpush3.bf16.msra.mxu0 %v3643_v28 }
 0x321   :  { %3067 = vmatprep.subr.bf16.mxu0 %v3465_v20 }
 0x322   :  { %3054 = vmatpush3.bf16.msra.mxu1 %v3696_v3 }
 0x323   :  { %3061 = vmatprep.subr.bf16.mxu1 %v3465_v20 }
 0x3ee   :  { %v304_v35 = vpop.f32.mrb[0].mxu1  ;;  %v404_v36 = vpop.f32.mrb[2].mxu0 }
 0x3ef   :  { %v305_v37 = vadd.f32 %v3666_v34, %v304_v35  ;;  %v408_v38 = vadd.f32 %v404_v36, %v3603_v5  ;;  %v2764_v39 = vpop.f32.mrb[1].mxu1  ;;  %v2775_v40 = vpop.f32.mrb[3].mxu0 }
 0x3f1   :  { %3219 = vtanh.f32 %v305_v37  ;;  %v2570_v43 = vmul.f32 -1.442695, %v305_v37  ;;  %v2572_v44 = vmul.f32 -1.442695, %v408_v38 }
 0x3f2   :  { %3221 = vtanh.f32 %v408_v38 }
 0x3f3   :  { %3223 = vpow2.f32 %v2570_v43 }
 0x3f4   :  { %3225 = vpow2.f32 %v2572_v44 }
 0x3fb   :  { %v3220_v41 = vpop.eup %3219 }
 0x3fc   :  { %v3222_v42 = vpop.eup %3221  ;;  %317 = vrot.lane.b32.xlu0 %v3220_v41, %s3463_s8 }
 0x3fd   :  { %418 = vrot.lane.b32.xlu1 %v3222_v42, %s3463_s8  ;;  %v3224_v45 = vpop.eup %3223 }
 0x3fe   :  { %v3226_v46 = vpop.eup %3225  ;;  %v311_v47 = vadd.f32 1.0, %v3224_v45 }
 0x3ff   :  { %v412_v48 = vadd.f32 1.0, %v3226_v46 }
 0x400   :  { %3227 = vrcp.f32 %v311_v47 }
 0x401   :  { %3229 = vrcp.f32 %v412_v48 }
 0x40a   :  { %v3228_v49 = vpop.eup %3227 }
 0x40b   :  { %v3230_v51 = vpop.eup %3229  ;;  %v315_v55 = vmul.f32 0.0, %v3228_v49 }
 0x40c   :  { %v416_v57 = vmul.f32 %v3230_v51, %v3609_v16 }
 0x46e   :  { %v318_v50 = vpop.permute.xlu0 %317 }
 0x46f   :  { %v320_v52 = vmul.f32 %v3228_v49, %v318_v50  ;;  %v419_v53 = vpop.permute.xlu1 %418 }
 0x470   :  { %v421_v54 = vmul.f32 %v3230_v51, %v419_v53 }
 0x471   :  { %322 = vrot.lane.b32.xlu0 %v320_v52, %s3464_s1 }
 0x472   :  { %423 = vrot.lane.b32.xlu1 %v421_v54, %s3464_s1 }
 0x4e3   :  { %v323_v56 = vpop.permute.xlu0 %322 }
 0x4e4   :  { %v3675_v58 = vadd.f32 %v323_v56, %v315_v55  ;;  %v424_v59 = vpop.permute.xlu1 %423 }
 0x4e5   :  { %v3677_v60 = vadd.f32 %v424_v59, %v416_v57 }
 0x4e6   :  { %3231 = vtanh.f32 %v3675_v58 }
 0x4e7   :  { %3233 = vtanh.f32 %v3677_v60 }
 0x4f0   :  { %v3232_v4 = vpop.eup %3231 }
 0x4f1   :  { %v3234_v6 = vpop.eup %3233  ;;  %328 = vrot.lane.b32.xlu0 %v3232_v4, %s3463_s8 }
 0x4f2   :  { %429 = vrot.lane.b32.xlu1 %v3234_v6, %s3463_s8 }
 0x563   :  { %v329_v7 = vpop.permute.xlu0 %328 }
 0x564   :  { %v331_v8 = vmul.f32 %v3228_v49, %v329_v7  ;;  %v430_v9 = vpop.permute.xlu1 %429 }
 0x565   :  { %v432_v10 = vmul.f32 %v3230_v51, %v430_v9 }
 0x566   :  { %333 = vrot.lane.b32.xlu0 %v331_v8, %s3464_s1 }
 0x567   :  { %506 = vrot.lane.b32.xlu1 %v432_v10, %s3464_s1 }
 0x5d8   :  { %v334_v11 = vpop.permute.xlu0 %333 }
 0x5d9   :  { %337 = vst.msk [vmem:[#allocation2] sm:$0x3] %vm336_vm4, %v334_v11  ;;  %v507_v12 = vpop.permute.xlu1 %506  ;;  %2785 = vmatmul.mubr.msk.f32.vlgmr.msra.gmra.mrb[2].mxu1 %vm235_vm3, %v334_v11 }
 0x5da   :  { %2796 = vmatmul.mubr.msk.f32.vlgmr.msra.gmra.mrb[4].mxu0 %vm235_vm3, %v507_v12  ;;  %3063 = vmatpush3.bf16.msra.mxu1 %v3634_v25 }
 0x5db   :  { %3064 = vmatprep.subr.bf16.mxu1 %v3465_v20  ;;  %2806 = vmatprep.mubr.msk.f32.mxu1 %vm3462_vm0, %v3461_v0 }
 0x5dc   :  { %3069 = vmatpush3.bf16.msra.mxu0 %v3690_v1  ;;  %2817 = vmatprep.mubr.msk.f32.mxu0 %vm3462_vm0, %v3461_v0 }
 0x5dd   :  { %3070 = vmatprep.subr.bf16.mxu0 %v3465_v20 }
 0x5de   :  { %3066 = vmatpush3.bf16.msra.mxu1 %v3647_v29 }
 0x5df   :  { %3073 = vmatprep.subr.bf16.mxu1 %v3465_v20 }
 0x5e0   :  { %3072 = vmatpush3.bf16.msra.mxu0 %v3696_v3 }
 0x5e1   :  { %2807 = vmatmul.mubr.msk.f32.vlgmr.msra.gmra.mrb[4].mxu1 %vm235_vm3, %v507_v12  ;;  %3079 = vmatprep.subr.bf16.mxu0 %v3465_v20 }
 0x5e2   :  { %3075 = vmatpush3.bf16.msra.mxu1 %v3623_v21  ;;  %2828 = vmatprep.mubr.msk.f32.mxu1 %vm3462_vm0, %v3461_v0 }
 0x5e3   :  { %3076 = vmatprep.subr.bf16.mxu1 %v3465_v20 }
 0x5e6   :  { %3078 = vmatpush3.bf16.msra.mxu1 %v3643_v28 }
 0x5e7   :  { %3085 = vmatprep.subr.bf16.mxu1 %v3465_v20 }
 0x6ac   :  { %v501_v13 = vpop.f32.mrb[2].mxu1 }
 0x6ad   :  { %v576_v14 = vpop.f32.mrb[4].mxu0  ;;  %v2786_v15 = vpop.f32.mrb[3].mxu1 }
 0x6ae   :  { %v577_v16 = vadd.f32 %v576_v14, %v501_v13  ;;  %v2797_v17 = vpop.f32.mrb[5].mxu0 }
 0x6b0   :  { %v580_v18 = vadd.f32 %v3666_v34, %v577_v16 }
 0x6b2   :  { %3235 = vtanh.f32 %v580_v18  ;;  %v2575_v27 = vmul.f32 -1.442695, %v580_v18 }
 0x6b4   :  { %v676_v19 = vpop.f32.mrb[4].mxu1 }
 0x6b5   :  { %v680_v22 = vadd.f32 %v676_v19, %v3603_v5  ;;  %v2808_v23 = vpop.f32.mrb[5].mxu1 }
 0x6b7   :  { %3237 = vtanh.f32 %v680_v22  ;;  %v2577_v30 = vmul.f32 -1.442695, %v680_v22 }
 0x6b8   :  { %3239 = vpow2.f32 %v2575_v27 }
 0x6b9   :  { %3241 = vpow2.f32 %v2577_v30 }
 0x6bc   :  { %v3236_v24 = vpop.eup %3235 }
 0x6bd   :  { %590 = vrot.lane.b32.xlu0 %v3236_v24, %s3463_s8 }
 0x6c1   :  { %v3238_v26 = vpop.eup %3237 }
 0x6c2   :  { %690 = vrot.lane.b32.xlu1 %v3238_v26, %s3463_s8  ;;  %v3240_v31 = vpop.eup %3239 }
 0x6c3   :  { %v584_v32 = vadd.f32 1.0, %v3240_v31  ;;  %v3242_v33 = vpop.eup %3241 }
 0x6c4   :  { %v684_v35 = vadd.f32 1.0, %v3242_v33 }
 0x6c5   :  { %3243 = vrcp.f32 %v584_v32 }
 0x6c6   :  { %3245 = vrcp.f32 %v684_v35 }
 0x6cf   :  { %v3244_v36 = vpop.eup %3243 }
 0x6d0   :  { %v3246_v39 = vpop.eup %3245  ;;  %v588_v42 = vmul.f32 %v3244_v36, %v3675_v58 }
 0x6d1   :  { %v688_v45 = vmul.f32 %v3246_v39, %v3677_v60 }
 0x72f   :  { %v591_v37 = vpop.permute.xlu0 %590 }
 0x730   :  { %v593_v38 = vmul.f32 %v3244_v36, %v591_v37 }
 0x732   :  { %595 = vrot.lane.b32.xlu0 %v593_v38, %s3464_s1 }
 0x734   :  { %v691_v40 = vpop.permute.xlu1 %690 }
 0x735   :  { %v693_v41 = vmul.f32 %v3246_v39, %v691_v40 }
 0x737   :  { %695 = vrot.lane.b32.xlu1 %v693_v41, %s3464_s1 }
 0x7a4   :  { %v596_v43 = vpop.permute.xlu0 %595 }
 0x7a5   :  { %v3734_v44 = vadd.f32 %v596_v43, %v588_v42 }
 0x7a7   :  { %3247 = vtanh.f32 %v3734_v44 }
 0x7a9   :  { %v696_v46 = vpop.permute.xlu1 %695 }
 0x7aa   :  { %v3738_v47 = vadd.f32 %v696_v46, %v688_v45 }
 0x7ac   :  { %3249 = vtanh.f32 %v3738_v47 }
 0x7b1   :  { %v3248_v48 = vpop.eup %3247 }
 0x7b2   :  { %601 = vrot.lane.b32.xlu0 %v3248_v48, %s3463_s8 }
 0x7b6   :  { %v3250_v49 = vpop.eup %3249 }
 0x7b7   :  { %701 = vrot.lane.b32.xlu1 %v3250_v49, %s3463_s8 }
 0x824   :  { %v602_v50 = vpop.permute.xlu0 %601 }
 0x825   :  { %v604_v51 = vmul.f32 %v3244_v36, %v602_v50 }
 0x827   :  { %606 = vrot.lane.b32.xlu0 %v604_v51, %s3464_s1 }
 0x829   :  { %v702_v52 = vpop.permute.xlu1 %701 }
 0x82a   :  { %v704_v53 = vmul.f32 %v3246_v39, %v702_v52 }
 0x82c   :  { %778 = vrot.lane.b32.xlu1 %v704_v53, %s3464_s1 }
 0x899   :  { %v607_v54 = vpop.permute.xlu0 %606 }
 0x89a   :  { %609 = vst.msk [vmem:[#allocation2 + $0x2] sm:$0x3] %vm336_vm4, %v607_v54  ;;  %2818 = vmatmul.mubr.msk.f32.vlgmr.msra.gmra.mrb[6].mxu0 %vm235_vm3, %v607_v54 }
 0x89b   :  { %3081 = vmatpush3.bf16.msra.mxu0 %v3634_v25  ;;  %2839 = vmatprep.mubr.msk.f32.mxu0 %vm3462_vm0, %v3461_v0 }
 0x89c   :  { %3082 = vmatprep.subr.bf16.mxu0 %v3465_v20 }
 0x89e   :  { %v779_v55 = vpop.permute.xlu1 %778 }
 0x89f   :  { %3084 = vmatpush3.bf16.msra.mxu0 %v3647_v29  ;;  %2829 = vmatmul.mubr.msk.f32.vlgmr.msra.gmra.mrb[6].mxu1 %vm235_vm3, %v779_v55 }
 0x8a0   :  { %3087 = vmatpush3.bf16.msra.mxu1 %v3690_v1  ;;  %3091 = vmatprep.subr.bf16.mxu0 %v3465_v20 }
 0x8a1   :  { %3088 = vmatprep.subr.bf16.mxu1 %v3465_v20  ;;  %2850 = vmatprep.mubr.msk.f32.mxu1 %vm3462_vm0, %v3461_v0 }
 0x8a2   :  { %2840 = vmatmul.mubr.msk.f32.vlgmr.msra.gmra.mrb[8].mxu0 %vm235_vm3, %v779_v55 }
 0x8a3   :  { %3093 = vmatpush3.bf16.msra.mxu0 %v3623_v21  ;;  %2861 = vmatprep.mubr.msk.f32.mxu0 %vm3462_vm0, %v3461_v0 }
 0x8a4   :  { %3090 = vmatpush3.bf16.msra.mxu1 %v3696_v3  ;;  %3094 = vmatprep.subr.bf16.mxu0 %v3465_v20 }
 0x8a5   :  { %3097 = vmatprep.subr.bf16.mxu1 %v3465_v20 }
 0x8a7   :  { %3096 = vmatpush3.bf16.msra.mxu0 %v3643_v28 }
 0x8a8   :  { %3103 = vmatprep.subr.bf16.mxu0 %v3465_v20 }
 0x96d   :  { %v773_v56 = vpop.f32.mrb[6].mxu0 }
 0x96e   :  { %v2819_v57 = vpop.f32.mrb[7].mxu0 }
 0x972   :  { %v848_v58 = vpop.f32.mrb[6].mxu1 }
 0x973   :  { %v849_v59 = vadd.f32 %v848_v58, %v773_v56  ;;  %v2830_v60 = vpop.f32.mrb[7].mxu1 }
 0x975   :  { %v852_v61 = vadd.f32 %v3666_v34, %v849_v59  ;;  %v948_v62 = vpop.f32.mrb[8].mxu0 }
 0x976   :  { %v952_v63 = vadd.f32 %v948_v62, %v3603_v5  ;;  %v2841_v2 = vpop.f32.mrb[9].mxu0 }
 0x977   :  { %3251 = vtanh.f32 %v852_v61  ;;  %v2580_v7 = vmul.f32 -1.442695, %v852_v61 }
 0x978   :  { %3253 = vtanh.f32 %v952_v63  ;;  %v2582_v8 = vmul.f32 -1.442695, %v952_v63 }
 0x979   :  { %3255 = vpow2.f32 %v2580_v7 }
 0x97a   :  { %3257 = vpow2.f32 %v2582_v8 }
 0x981   :  { %v3252_v4 = vpop.eup %3251 }
 0x982   :  { %v3254_v6 = vpop.eup %3253  ;;  %862 = vrot.lane.b32.xlu0 %v3252_v4, %s3463_s8 }
 0x983   :  { %962 = vrot.lane.b32.xlu1 %v3254_v6, %s3463_s8  ;;  %v3256_v9 = vpop.eup %3255 }
 0x984   :  { %v3258_v10 = vpop.eup %3257  ;;  %v856_v11 = vadd.f32 1.0, %v3256_v9 }
 0x985   :  { %v956_v12 = vadd.f32 1.0, %v3258_v10 }
 0x986   :  { %3259 = vrcp.f32 %v856_v11 }
 0x987   :  { %3261 = vrcp.f32 %v956_v12 }
 0x990   :  { %v3260_v13 = vpop.eup %3259 }
 0x991   :  { %v3262_v15 = vpop.eup %3261  ;;  %v860_v19 = vmul.f32 %v3260_v13, %v3734_v44 }
 0x992   :  { %v960_v23 = vmul.f32 %v3262_v15, %v3738_v47 }
 0x9f4   :  { %v863_v14 = vpop.permute.xlu0 %862 }
 0x9f5   :  { %v865_v16 = vmul.f32 %v3260_v13, %v863_v14  ;;  %v963_v17 = vpop.permute.xlu1 %962 }
 0x9f6   :  { %v965_v18 = vmul.f32 %v3262_v15, %v963_v17 }
 0x9f7   :  { %867 = vrot.lane.b32.xlu0 %v865_v16, %s3464_s1 }
 0x9f8   :  { %967 = vrot.lane.b32.xlu1 %v965_v18, %s3464_s1 }
 0xa69   :  { %v868_v22 = vpop.permute.xlu0 %867 }
 0xa6a   :  { %v3775_v24 = vadd.f32 %v868_v22, %v860_v19  ;;  %v968_v26 = vpop.permute.xlu1 %967 }
 0xa6b   :  { %v3777_v27 = vadd.f32 %v968_v26, %v960_v23 }
 0xa6c   :  { %3263 = vtanh.f32 %v3775_v24 }
 0xa6d   :  { %3265 = vtanh.f32 %v3777_v27 }
 0xa76   :  { %v3264_v30 = vpop.eup %3263 }
 0xa77   :  { %v3266_v31 = vpop.eup %3265  ;;  %873 = vrot.lane.b32.xlu0 %v3264_v30, %s3463_s8 }
 0xa78   :  { %973 = vrot.lane.b32.xlu1 %v3266_v31, %s3463_s8 }
 0xae9   :  { %v874_v32 = vpop.permute.xlu0 %873 }
 0xaea   :  { %v876_v33 = vmul.f32 %v3260_v13, %v874_v32  ;;  %v974_v35 = vpop.permute.xlu1 %973 }
 0xaeb   :  { %v976_v36 = vmul.f32 %v3262_v15, %v974_v35 }
 0xaec   :  { %878 = vrot.lane.b32.xlu0 %v876_v33, %s3464_s1 }
 0xaed   :  { %1050 = vrot.lane.b32.xlu1 %v976_v36, %s3464_s1 }
 0xb5e   :  { %v879_v37 = vpop.permute.xlu0 %878 }
 0xb5f   :  { %881 = vst.msk [vmem:[#allocation2 + $0x4] sm:$0x3] %vm336_vm4, %v879_v37  ;;  %v1051_v38 = vpop.permute.xlu1 %1050  ;;  %2851 = vmatmul.mubr.msk.f32.vlgmr.msra.gmra.mrb[8].mxu1 %vm235_vm3, %v879_v37 }
 0xb60   :  { %2862 = vmatmul.mubr.msk.f32.vlgmr.msra.gmra.mrb[10].mxu0 %vm235_vm3, %v1051_v38  ;;  %3099 = vmatpush3.bf16.msra.mxu1 %v3634_v25 }
 0xb61   :  { %3100 = vmatprep.subr.bf16.mxu1 %v3465_v20  ;;  %2872 = vmatprep.mubr.msk.f32.mxu1 %vm3462_vm0, %v3461_v0 }
 0xb62   :  { %3105 = vmatpush3.bf16.msra.mxu0 %v3690_v1  ;;  %2883 = vmatprep.mubr.msk.f32.mxu0 %vm3462_vm0, %v3461_v0 }
 0xb63   :  { %3106 = vmatprep.subr.bf16.mxu0 %v3465_v20 }
 0xb64   :  { %3102 = vmatpush3.bf16.msra.mxu1 %v3647_v29 }
 0xb65   :  { %3109 = vmatprep.subr.bf16.mxu1 %v3465_v20 }
 0xb66   :  { %3108 = vmatpush3.bf16.msra.mxu0 %v3696_v3 }
 0xb67   :  { %2873 = vmatmul.mubr.msk.f32.vlgmr.msra.gmra.mrb[10].mxu1 %vm235_vm3, %v1051_v38  ;;  %3115 = vmatprep.subr.bf16.mxu0 %v3465_v20 }
 0xb68   :  { %3111 = vmatpush3.bf16.msra.mxu1 %v3623_v21  ;;  %2894 = vmatprep.mubr.msk.f32.mxu1 %vm3462_vm0, %v3461_v0 }
 0xb69   :  { %3112 = vmatprep.subr.bf16.mxu1 %v3465_v20 }
 0xb6c   :  { %3114 = vmatpush3.bf16.msra.mxu1 %v3643_v28 }
 0xb6d   :  { %3121 = vmatprep.subr.bf16.mxu1 %v3465_v20 }
 0xc32   :  { %v1045_v39 = vpop.f32.mrb[8].mxu1 }
 0xc33   :  { %v1120_v40 = vpop.f32.mrb[10].mxu0  ;;  %v2852_v41 = vpop.f32.mrb[9].mxu1 }
 0xc34   :  { %v1121_v42 = vadd.f32 %v1120_v40, %v1045_v39  ;;  %v2863_v43 = vpop.f32.mrb[11].mxu0 }
 0xc36   :  { %v1124_v44 = vadd.f32 %v3666_v34, %v1121_v42 }
 0xc38   :  { %3267 = vtanh.f32 %v1124_v44  ;;  %v2585_v50 = vmul.f32 -1.442695, %v1124_v44 }
 0xc3a   :  { %v1220_v45 = vpop.f32.mrb[10].mxu1 }
 0xc3b   :  { %v1224_v46 = vadd.f32 %v1220_v45, %v3603_v5  ;;  %v2874_v47 = vpop.f32.mrb[11].mxu1 }
 0xc3d   :  { %3269 = vtanh.f32 %v1224_v46  ;;  %v2587_v51 = vmul.f32 -1.442695, %v1224_v46 }
 0xc3e   :  { %3271 = vpow2.f32 %v2585_v50 }
 0xc3f   :  { %3273 = vpow2.f32 %v2587_v51 }
 0xc42   :  { %v3268_v48 = vpop.eup %3267 }
 0xc43   :  { %1134 = vrot.lane.b32.xlu0 %v3268_v48, %s3463_s8 }
 0xc47   :  { %v3270_v49 = vpop.eup %3269 }
 0xc48   :  { %1234 = vrot.lane.b32.xlu1 %v3270_v49, %s3463_s8  ;;  %v3272_v52 = vpop.eup %3271 }
 0xc49   :  { %v1128_v53 = vadd.f32 1.0, %v3272_v52  ;;  %v3274_v54 = vpop.eup %3273 }
 0xc4a   :  { %v1228_v55 = vadd.f32 1.0, %v3274_v54 }
 0xc4b   :  { %3275 = vrcp.f32 %v1128_v53 }
 0xc4c   :  { %3277 = vrcp.f32 %v1228_v55 }
 0xc55   :  { %v3276_v56 = vpop.eup %3275 }
 0xc56   :  { %v3278_v59 = vpop.eup %3277  ;;  %v1132_v62 = vmul.f32 %v3276_v56, %v3775_v24 }
 0xc57   :  { %v1232_v4 = vmul.f32 %v3278_v59, %v3777_v27 }
 0xcb5   :  { %v1135_v57 = vpop.permute.xlu0 %1134 }
 0xcb6   :  { %v1137_v58 = vmul.f32 %v3276_v56, %v1135_v57 }
 0xcb8   :  { %1139 = vrot.lane.b32.xlu0 %v1137_v58, %s3464_s1 }
 0xcba   :  { %v1235_v60 = vpop.permute.xlu1 %1234 }
 0xcbb   :  { %v1237_v61 = vmul.f32 %v3278_v59, %v1235_v60 }
 0xcbd   :  { %1239 = vrot.lane.b32.xlu1 %v1237_v61, %s3464_s1 }
 0xd2a   :  { %v1140_v63 = vpop.permute.xlu0 %1139 }
 0xd2b   :  { %v3814_v2 = vadd.f32 %v1140_v63, %v1132_v62 }
 0xd2d   :  { %3279 = vtanh.f32 %v3814_v2 }
 0xd2f   :  { %v1240_v6 = vpop.permute.xlu1 %1239 }
 0xd30   :  { %v3818_v7 = vadd.f32 %v1240_v6, %v1232_v4 }
 0xd32   :  { %3281 = vtanh.f32 %v3818_v7 }
 0xd37   :  { %v3280_v8 = vpop.eup %3279 }
 0xd38   :  { %1145 = vrot.lane.b32.xlu0 %v3280_v8, %s3463_s8 }
 0xd3c   :  { %v3282_v9 = vpop.eup %3281 }
 0xd3d   :  { %1245 = vrot.lane.b32.xlu1 %v3282_v9, %s3463_s8 }
 0xdaa   :  { %v1146_v10 = vpop.permute.xlu0 %1145 }
 0xdab   :  { %v1148_v11 = vmul.f32 %v3276_v56, %v1146_v10 }
 0xdad   :  { %1150 = vrot.lane.b32.xlu0 %v1148_v11, %s3464_s1 }
 0xdaf   :  { %v1246_v12 = vpop.permute.xlu1 %1245 }
 0xdb0   :  { %v1248_v13 = vmul.f32 %v3278_v59, %v1246_v12 }
 0xdb2   :  { %1322 = vrot.lane.b32.xlu1 %v1248_v13, %s3464_s1 }
 0xe1f   :  { %v1151_v14 = vpop.permute.xlu0 %1150 }
 0xe20   :  { %1153 = vst.msk [vmem:[#allocation2 + $0x6] sm:$0x3] %vm336_vm4, %v1151_v14  ;;  %2884 = vmatmul.mubr.msk.f32.vlgmr.msra.gmra.mrb[12].mxu0 %vm235_vm3, %v1151_v14 }
 0xe21   :  { %3117 = vmatpush3.bf16.msra.mxu0 %v3634_v25  ;;  %2905 = vmatprep.mubr.msk.f32.mxu0 %vm3462_vm0, %v3461_v0 }
 0xe22   :  { %3118 = vmatprep.subr.bf16.mxu0 %v3465_v20 }
 0xe24   :  { %v1323_v15 = vpop.permute.xlu1 %1322 }
 0xe25   :  { %3120 = vmatpush3.bf16.msra.mxu0 %v3647_v29  ;;  %2895 = vmatmul.mubr.msk.f32.vlgmr.msra.gmra.mrb[12].mxu1 %vm235_vm3, %v1323_v15 }
 0xe26   :  { %3123 = vmatpush3.bf16.msra.mxu1 %v3690_v1  ;;  %3127 = vmatprep.subr.bf16.mxu0 %v3465_v20 }
 0xe27   :  { %3124 = vmatprep.subr.bf16.mxu1 %v3465_v20  ;;  %2916 = vmatprep.mubr.msk.f32.mxu1 %vm3462_vm0, %v3461_v0 }
 0xe28   :  { %2906 = vmatmul.mubr.msk.f32.vlgmr.msra.gmra.mrb[14].mxu0 %vm235_vm3, %v1323_v15 }
 0xe29   :  { %3129 = vmatpush3.bf16.msra.mxu0 %v3623_v21  ;;  %2927 = vmatprep.mubr.msk.f32.mxu0 %vm3462_vm0, %v3461_v0 }
 0xe2a   :  { %3126 = vmatpush3.bf16.msra.mxu1 %v3696_v3  ;;  %3130 = vmatprep.subr.bf16.mxu0 %v3465_v20 }
 0xe2b   :  { %3133 = vmatprep.subr.bf16.mxu1 %v3465_v20 }
 0xe2d   :  { %3132 = vmatpush3.bf16.msra.mxu0 %v3643_v28 }
 0xe2e   :  { %3139 = vmatprep.subr.bf16.mxu0 %v3465_v20 }
 0xef3   :  { %v1317_v16 = vpop.f32.mrb[12].mxu0 }
 0xef4   :  { %v2885_v17 = vpop.f32.mrb[13].mxu0 }
 0xef8   :  { %v1392_v18 = vpop.f32.mrb[12].mxu1 }
 0xef9   :  { %v1393_v19 = vadd.f32 %v1392_v18, %v1317_v16  ;;  %v2896_v22 = vpop.f32.mrb[13].mxu1 }
 0xefb   :  { %v1396_v23 = vadd.f32 %v3666_v34, %v1393_v19  ;;  %v1492_v24 = vpop.f32.mrb[14].mxu0 }
 0xefc   :  { %v1496_v26 = vadd.f32 %v1492_v24, %v3603_v5  ;;  %v2907_v27 = vpop.f32.mrb[15].mxu0 }
 0xefd   :  { %3283 = vtanh.f32 %v1396_v23  ;;  %v2590_v32 = vmul.f32 -1.442695, %v1396_v23 }
 0xefe   :  { %3285 = vtanh.f32 %v1496_v26  ;;  %v2592_v33 = vmul.f32 -1.442695, %v1496_v26 }
 0xeff   :  { %3287 = vpow2.f32 %v2590_v32 }
 0xf00   :  { %3289 = vpow2.f32 %v2592_v33 }
 0xf07   :  { %v3284_v30 = vpop.eup %3283 }
 0xf08   :  { %v3286_v31 = vpop.eup %3285  ;;  %1406 = vrot.lane.b32.xlu0 %v3284_v30, %s3463_s8 }
 0xf09   :  { %1506 = vrot.lane.b32.xlu1 %v3286_v31, %s3463_s8  ;;  %v3288_v35 = vpop.eup %3287 }
 0xf0a   :  { %v3290_v36 = vpop.eup %3289  ;;  %v1400_v37 = vadd.f32 1.0, %v3288_v35 }
 0xf0b   :  { %v1500_v38 = vadd.f32 1.0, %v3290_v36 }
 0xf0c   :  { %3291 = vrcp.f32 %v1400_v37 }
 0xf0d   :  { %3293 = vrcp.f32 %v1500_v38 }
 0xf16   :  { %v3292_v39 = vpop.eup %3291 }
 0xf17   :  { %v3294_v41 = vpop.eup %3293  ;;  %v1404_v45 = vmul.f32 %v3292_v39, %v3814_v2 }
 0xf18   :  { %v1504_v47 = vmul.f32 %v3294_v41, %v3818_v7 }
 0xf7a   :  { %v1407_v40 = vpop.permute.xlu0 %1406 }
 0xf7b   :  { %v1409_v42 = vmul.f32 %v3292_v39, %v1407_v40  ;;  %v1507_v43 = vpop.permute.xlu1 %1506 }
 0xf7c   :  { %v1509_v44 = vmul.f32 %v3294_v41, %v1507_v43 }
 0xf7d   :  { %1411 = vrot.lane.b32.xlu0 %v1409_v42, %s3464_s1 }
 0xf7e   :  { %1511 = vrot.lane.b32.xlu1 %v1509_v44, %s3464_s1 }
 0xfef   :  { %v1412_v46 = vpop.permute.xlu0 %1411 }
 0xff0   :  { %v3855_v48 = vadd.f32 %v1412_v46, %v1404_v45  ;;  %v1512_v49 = vpop.permute.xlu1 %1511 }
 0xff1   :  { %v3857_v50 = vadd.f32 %v1512_v49, %v1504_v47 }
 0xff2   :  { %3295 = vtanh.f32 %v3855_v48 }
 0xff3   :  { %3297 = vtanh.f32 %v3857_v50 }
 0xffc   :  { %v3296_v51 = vpop.eup %3295 }
 0xffd   :  { %v3298_v52 = vpop.eup %3297  ;;  %1417 = vrot.lane.b32.xlu0 %v3296_v51, %s3463_s8 }
 0xffe   :  { %1517 = vrot.lane.b32.xlu1 %v3298_v52, %s3463_s8 }
0x106f   :  { %v1418_v53 = vpop.permute.xlu0 %1417 }
0x1070   :  { %v1420_v54 = vmul.f32 %v3292_v39, %v1418_v53  ;;  %v1518_v55 = vpop.permute.xlu1 %1517 }
0x1071   :  { %v1520_v56 = vmul.f32 %v3294_v41, %v1518_v55 }
0x1072   :  { %1422 = vrot.lane.b32.xlu0 %v1420_v54, %s3464_s1 }
0x1073   :  { %1594 = vrot.lane.b32.xlu1 %v1520_v56, %s3464_s1 }
0x10e4   :  { %v1423_v57 = vpop.permute.xlu0 %1422 }
0x10e5   :  { %1425 = vst.msk [vmem:[#allocation2 + $0x8] sm:$0x3] %vm336_vm4, %v1423_v57  ;;  %v1595_v58 = vpop.permute.xlu1 %1594  ;;  %2917 = vmatmul.mubr.msk.f32.vlgmr.msra.gmra.mrb[14].mxu1 %vm235_vm3, %v1423_v57 }
0x10e6   :  { %2928 = vmatmul.mubr.msk.f32.vlgmr.msra.gmra.mrb[16].mxu0 %vm235_vm3, %v1595_v58  ;;  %3135 = vmatpush3.bf16.msra.mxu1 %v3634_v25 }
0x10e7   :  { %3136 = vmatprep.subr.bf16.mxu1 %v3465_v20  ;;  %2938 = vmatprep.mubr.msk.f32.mxu1 %vm3462_vm0, %v3461_v0 }
0x10e8   :  { %3141 = vmatpush3.bf16.msra.mxu0 %v3690_v1  ;;  %2949 = vmatprep.mubr.msk.f32.mxu0 %vm3462_vm0, %v3461_v0 }
0x10e9   :  { %3142 = vmatprep.subr.bf16.mxu0 %v3465_v20 }
0x10ea   :  { %3138 = vmatpush3.bf16.msra.mxu1 %v3647_v29 }
0x10eb   :  { %3145 = vmatprep.subr.bf16.mxu1 %v3465_v20 }
0x10ec   :  { %3144 = vmatpush3.bf16.msra.mxu0 %v3696_v3 }
0x10ed   :  { %2939 = vmatmul.mubr.msk.f32.vlgmr.msra.gmra.mrb[16].mxu1 %vm235_vm3, %v1595_v58  ;;  %3151 = vmatprep.subr.bf16.mxu0 %v3465_v20 }
0x10ee   :  { %3147 = vmatpush3.bf16.msra.mxu1 %v3623_v21  ;;  %2960 = vmatprep.mubr.msk.f32.mxu1 %vm3462_vm0, %v3461_v0 }
0x10ef   :  { %3148 = vmatprep.subr.bf16.mxu1 %v3465_v20 }
0x10f2   :  { %3150 = vmatpush3.bf16.msra.mxu1 %v3643_v28 }
0x10f3   :  { %3157 = vmatprep.subr.bf16.mxu1 %v3465_v20 }
0x11b8   :  { %v1589_v59 = vpop.f32.mrb[14].mxu1 }
0x11b9   :  { %v1664_v60 = vpop.f32.mrb[16].mxu0  ;;  %v2918_v61 = vpop.f32.mrb[15].mxu1 }
0x11ba   :  { %v1665_v62 = vadd.f32 %v1664_v60, %v1589_v59  ;;  %v2929_v63 = vpop.f32.mrb[17].mxu0 }
0x11bc   :  { %v1668_v2 = vadd.f32 %v3666_v34, %v1665_v62 }
0x11be   :  { %3299 = vtanh.f32 %v1668_v2  ;;  %v2595_v10 = vmul.f32 -1.442695, %v1668_v2 }
0x11c0   :  { %v1764_v4 = vpop.f32.mrb[16].mxu1 }
0x11c1   :  { %v1768_v6 = vadd.f32 %v1764_v4, %v3603_v5  ;;  %v2940_v7 = vpop.f32.mrb[17].mxu1 }
0x11c3   :  { %3301 = vtanh.f32 %v1768_v6  ;;  %v2597_v11 = vmul.f32 -1.442695, %v1768_v6 }
0x11c4   :  { %3303 = vpow2.f32 %v2595_v10  ;;  %v2242_v10 = vld [vmem:[#allocation2] sm:$0xff] }
0x11c5   :  { %3305 = vpow2.f32 %v2597_v11 }
0x11c8   :  { %v3300_v8 = vpop.eup %3299 }
0x11c9   :  { %1678 = vrot.lane.b32.xlu0 %v3300_v8, %s3463_s8 }
0x11cd   :  { %v3302_v9 = vpop.eup %3301 }
0x11ce   :  { %1778 = vrot.lane.b32.xlu1 %v3302_v9, %s3463_s8  ;;  %v3304_v12 = vpop.eup %3303 }
0x11cf   :  { %v1672_v13 = vadd.f32 1.0, %v3304_v12  ;;  %v3306_v14 = vpop.eup %3305 }
0x11d0   :  { %v1772_v15 = vadd.f32 1.0, %v3306_v14 }
0x11d1   :  { %3307 = vrcp.f32 %v1672_v13 }
0x11d2   :  { %3309 = vrcp.f32 %v1772_v15 }
0x11db   :  { %v3308_v16 = vpop.eup %3307 }
0x11dc   :  { %v3310_v19 = vpop.eup %3309  ;;  %v1676_v24 = vmul.f32 %v3308_v16, %v3855_v48 }
0x11dd   :  { %v1776_v30 = vmul.f32 %v3310_v19, %v3857_v50 }
0x123b   :  { %v1679_v17 = vpop.permute.xlu0 %1678 }
0x123c   :  { %v1681_v18 = vmul.f32 %v3308_v16, %v1679_v17 }
0x123e   :  { %1683 = vrot.lane.b32.xlu0 %v1681_v18, %s3464_s1 }
0x1240   :  { %v1779_v22 = vpop.permute.xlu1 %1778 }
0x1241   :  { %v1781_v23 = vmul.f32 %v3310_v19, %v1779_v22 }
0x1243   :  { %1783 = vrot.lane.b32.xlu1 %v1781_v23, %s3464_s1 }
0x12b0   :  { %v1684_v26 = vpop.permute.xlu0 %1683 }
0x12b1   :  { %v3894_v27 = vadd.f32 %v1684_v26, %v1676_v24 }
0x12b3   :  { %3311 = vtanh.f32 %v3894_v27 }
0x12b5   :  { %v1784_v31 = vpop.permute.xlu1 %1783 }
0x12b6   :  { %v3898_v32 = vadd.f32 %v1784_v31, %v1776_v30 }
0x12b8   :  { %3313 = vtanh.f32 %v3898_v32 }
0x12bd   :  { %v3312_v33 = vpop.eup %3311 }
0x12be   :  { %1689 = vrot.lane.b32.xlu0 %v3312_v33, %s3463_s8  ;;  %v2245_v33 = vld [vmem:[%s4043_s7 + $0x8] sm:$0xff] }
0x12c2   :  { %v3314_v35 = vpop.eup %3313 }
0x12c3   :  { %1789 = vrot.lane.b32.xlu1 %v3314_v35, %s3463_s8 }
0x1330   :  { %v1690_v36 = vpop.permute.xlu0 %1689 }
0x1331   :  { %v1692_v37 = vmul.f32 %v3308_v16, %v1690_v36  ;;  %v2246_v36 = vld [vmem:[%s4043_s7 + $0x10] sm:$0xff] }
0x1333   :  { %1694 = vrot.lane.b32.xlu0 %v1692_v37, %s3464_s1  ;;  %v2247_v37 = vld [vmem:[%s4043_s7 + $0x18] sm:$0xff] }
0x1335   :  { %v1790_v38 = vpop.permute.xlu1 %1789 }
0x1336   :  { %v1792_v39 = vmul.f32 %v3310_v19, %v1790_v38  ;;  %v3173_v38 = vpack.c.bf16 %v2247_v37, %v2246_v36 }
0x1338   :  { %1866 = vrot.lane.b32.xlu1 %v1792_v39, %s3464_s1  ;;  %v2338_v39 = vld [vmem:[%s4045_s9] sm:$0xff] }
0x13a5   :  { %v1695_v40 = vpop.permute.xlu0 %1694 }
0x13a6   :  { %1697 = vst.msk [vmem:[#allocation2 + $0xa] sm:$0x3] %vm336_vm4, %v1695_v40  ;;  %2950 = vmatmul.mubr.msk.f32.vlgmr.msra.gmra.mrb[18].mxu0 %vm235_vm3, %v1695_v40  ;;  %v2339_v40 = vld [vmem:[%s4045_s9 + $0x8] sm:$0xff] }
0x13a7   :  { %3153 = vmatpush3.bf16.msra.mxu0 %v3634_v25  ;;  %2971 = vmatprep.mubr.msk.f32.mxu0 %vm3462_vm0, %v3461_v0 }
0x13a8   :  { %3154 = vmatprep.subr.bf16.mxu0 %v3465_v20 }
0x13aa   :  { %v1867_v41 = vpop.permute.xlu1 %1866 }
0x13ab   :  { %3156 = vmatpush3.bf16.msra.mxu0 %v3647_v29  ;;  %2961 = vmatmul.mubr.msk.f32.vlgmr.msra.gmra.mrb[18].mxu1 %vm235_vm3, %v1867_v41 }
0x13ac   :  { %3163 = vmatprep.subr.bf16.mxu0 %v3465_v20  ;;  %3159 = vmatpush3.bf16.msra.mxu1 %v3690_v1 }
0x13ad   :  { %3160 = vmatprep.subr.bf16.mxu1 %v3465_v20  ;;  %2982 = vmatprep.mubr.msk.f32.mxu1 %vm3462_vm0, %v3461_v0 }
0x13ae   :  { %2972 = vmatmul.mubr.msk.f32.vlgmr.msra.gmra.mrb[20].mxu0 %vm235_vm3, %v1867_v41  ;;  %v2340_v41 = vld [vmem:[%s4045_s9 + $0x10] sm:$0xff] }
0x13af   :  { %3165 = vmatpush3.bf16.msra.mxu0 %v3623_v21  ;;  %2993 = vmatprep.mubr.msk.f32.mxu0 %vm3462_vm0, %v3461_v0 }
0x13b0   :  { %3166 = vmatprep.subr.bf16.mxu0 %v3465_v20  ;;  %3162 = vmatpush3.bf16.msra.mxu1 %v3696_v3 }
0x13b3   :  { %3168 = vmatpush3.bf16.msra.mxu0 %v3643_v28 }
0x1479   :  { %v1861_v25 = vpop.f32.mrb[18].mxu0 }
0x147a   :  { %v2951_v29 = vpop.f32.mrb[19].mxu0 }
0x147b   :  { %v2341_v29 = vld [vmem:[%s4045_s9 + $0x18] sm:$0xff] }
0x147e   :  { %v1936_v1 = vpop.f32.mrb[18].mxu1 }
0x147f   :  { %v1937_v42 = vadd.f32 %v1936_v1, %v1861_v25  ;;  %v2962_v43 = vpop.f32.mrb[19].mxu1  ;;  %v3177_v25 = vpack.c.bf16 %v2339_v40, %v2338_v39 }
0x1480   :  { %v2342_v43 = vld [vmem:[%s4045_s9 + $0x20] sm:$0xff] }
0x1481   :  { %v1940_v44 = vadd.f32 %v3666_v34, %v1937_v42  ;;  %v2036_v45 = vpop.f32.mrb[20].mxu0  ;;  %v3181_v42 = vpack.c.bf16 %v2341_v29, %v2340_v41  ;;  %3178 = vmatprep.subr.bf16.mxu0 %v3177_v25 }
0x1482   :  { %v2040_v46 = vadd.f32 %v2036_v45, %v3603_v5  ;;  %v2973_v21 = vpop.f32.mrb[21].mxu0 }
0x1483   :  { %3315 = vtanh.f32 %v1940_v44  ;;  %v2600_v20 = vmul.f32 -1.442695, %v1940_v44  ;;  %v2343_v44 = vld [vmem:[%s4045_s9 + $0x28] sm:$0xff] }
0x1484   :  { %3317 = vtanh.f32 %v2040_v46  ;;  %v2602_v28 = vmul.f32 -1.442695, %v2040_v46  ;;  %v3185_v46 = vpack.c.bf16 %v2343_v44, %v2342_v43 }
0x1485   :  { %3319 = vpow2.f32 %v2600_v20  ;;  %v2345_v20 = vld [vmem:[%s4045_s9 + $0x38] sm:$0xff] }
0x1486   :  { %3321 = vpow2.f32 %v2602_v28 }
0x148d   :  { %v3316_v0 = vpop.eup %3315 }
0x148e   :  { %v3318_v47 = vpop.eup %3317  ;;  %1950 = vrot.lane.b32.xlu0 %v3316_v0, %s3463_s8 }
0x148f   :  { %2050 = vrot.lane.b32.xlu1 %v3318_v47, %s3463_s8  ;;  %v3320_v3 = vpop.eup %3319  ;;  %v2344_v47 = vld [vmem:[%s4045_s9 + $0x30] sm:$0xff] }
0x1490   :  { %v3322_v48 = vpop.eup %3321  ;;  %v1944_v49 = vadd.f32 1.0, %v3320_v3  ;;  %v3189_v28 = vpack.c.bf16 %v2345_v20, %v2344_v47  ;;  %v2437_v3 = vld [vmem:[%s4047_s11] sm:$0xff] }
0x1491   :  { %v2044_v50 = vadd.f32 1.0, %v3322_v48  ;;  %v2438_v48 = vld [vmem:[%s4047_s11 + $0x8] sm:$0xff] }
0x1492   :  { %3323 = vrcp.f32 %v1944_v49  ;;  %v3193_v49 = vpack.c.bf16 %v2438_v48, %v2437_v3 }
0x1493   :  { %3325 = vrcp.f32 %v2044_v50  ;;  %v2606_v50 = vld [vmem:[#allocation10] ss:$0 sm:$0xff] }
0x149c   :  { %v3324_v5 = vpop.eup %3323 }
0x149d   :  { %v3326_v52 = vpop.eup %3325  ;;  %v1948_v56 = vmul.f32 %v3324_v5, %v3894_v27 }
0x149e   :  { %v2048_v58 = vmul.f32 %v3326_v52, %v3898_v32 }
0x1500   :  { %v1951_v51 = vpop.permute.xlu0 %1950 }
0x1501   :  { %v1953_v53 = vmul.f32 %v3324_v5, %v1951_v51  ;;  %v2051_v54 = vpop.permute.xlu1 %2050 }
0x1502   :  { %v2053_v55 = vmul.f32 %v3326_v52, %v2051_v54 }
0x1503   :  { %1955 = vrot.lane.b32.xlu0 %v1953_v53, %s3464_s1 }
0x1504   :  { %2055 = vrot.lane.b32.xlu1 %v2053_v55, %s3464_s1 }
0x1575   :  { %v1956_v57 = vpop.permute.xlu0 %1955 }
0x1576   :  { %v1958_v59 = vadd.f32 %v1956_v57, %v1948_v56  ;;  %v2056_v60 = vpop.permute.xlu1 %2055  ;;  %v2439_v56 = vld [vmem:[%s4047_s11 + $0x10] sm:$0xff]  ;;  %v2440_v57 = vld [vmem:[%s4047_s11 + $0x18] sm:$0xff] }
0x1577   :  { %v2058_v61 = vadd.f32 %v2056_v60, %v2048_v58  ;;  %v3197_v58 = vpack.c.bf16 %v2440_v57, %v2439_v56 }
0x1578   :  { %3327 = vtanh.f32 %v1958_v59 }
0x1579   :  { %3329 = vtanh.f32 %v2058_v61 }
0x1582   :  { %v3328_v62 = vpop.eup %3327 }
0x1583   :  { %v3330_v63 = vpop.eup %3329  ;;  %1961 = vrot.lane.b32.xlu0 %v3328_v62, %s3463_s8 }
0x1584   :  { %2061 = vrot.lane.b32.xlu1 %v3330_v63, %s3463_s8 }
0x15f5   :  { %v1962_v2 = vpop.permute.xlu0 %1961 }
0x15f6   :  { %v1964_v4 = vmul.f32 %v3324_v5, %v1962_v2  ;;  %v2062_v6 = vpop.permute.xlu1 %2061 }
0x15f7   :  { %v2064_v7 = vmul.f32 %v3326_v52, %v2062_v6  ;;  %v3339_v6 = vld [vmem:[#allocation3] sm:$0x3] }
0x15f8   :  { %1966 = vrot.lane.b32.xlu0 %v1964_v4, %s3464_s1 }
0x15f9   :  { %2138 = vrot.lane.b32.xlu1 %v2064_v7, %s3464_s1  ;;  %v2529_v7 = vmul.f32 0.5, %v3339_v6 }
0x166a   :  { %v1967_v8 = vpop.permute.xlu0 %1966 }
0x166b   :  { %1969 = vst.msk [vmem:[#allocation2 + $0xc] sm:$0x3] %vm336_vm4, %v1967_v8  ;;  %v2139_v9 = vpop.permute.xlu1 %2138  ;;  %2983 = vmatmul.mubr.msk.f32.vlgmr.msra.gmra.mrb[20].mxu1 %vm235_vm3, %v1967_v8  ;;  %v2612_v8 = vld [vmem:[%s4048_s12] ss:$0 sm:$0xff] }
0x166c   :  { %2994 = vmatmul.mubr.msk.f32.vlgmr.msra.gmra.mrb[22].mxu0 %vm235_vm3, %v2139_v9  ;;  %3004 = vmatprep.mubr.msk.f32.mxu1 %vm235_vm3, %v2242_v10  ;;  %v2534_v9 = vrot.slane %v2529_v7, 6  ;;  %v2539_v10 = vrot.slane %v2529_v7, 4 }
0x166d   :  { %3180 = vmatpush3.bf16.msra.mxu0 %v3177_v25 }
0x166e   :  { %3182 = vmatprep.subr.bf16.mxu0 %v3181_v42 }
0x1671   :  { %3184 = vmatpush3.bf16.msra.mxu0 %v3181_v42 }
0x1672   :  { %3186 = vmatprep.subr.bf16.mxu0 %v3185_v46 }
0x1675   :  { %3188 = vmatpush3.bf16.msra.mxu0 %v3185_v46 }
0x1676   :  { %3190 = vmatprep.subr.bf16.mxu0 %v3189_v28 }
0x1679   :  { %3192 = vmatpush3.bf16.msra.mxu0 %v3189_v28 }
0x173e   :  { %v2133_v11 = vpop.f32.mrb[20].mxu1 }
0x173f   :  { %v2208_v12 = vpop.f32.mrb[22].mxu0  ;;  %v2984_v13 = vpop.f32.mrb[21].mxu1 }
0x1740   :  { %v2209_v14 = vadd.f32 %v2208_v12, %v2133_v11  ;;  %v2995_v15 = vpop.f32.mrb[23].mxu0  ;;  %v2544_v11 = vrot.slane %v2529_v7, 2 }
0x1742   :  { %v2212_v16 = vadd.f32 %v3666_v34, %v2209_v14  ;;  %v2244_v34 = vld [vmem:[%s4043_s7] sm:$0xff] }
0x1743   :  { %v3169_v35 = vpack.c.bf16 %v2245_v33, %v2244_v34 }
0x1744   :  { %3331 = vtanh.f32 %v2212_v16  ;;  %v2605_v18 = vmul.f32 -1.442695, %v2212_v16 }
0x1745   :  { %3170 = vmatprep.subr.bf16.mxu1 %v3169_v35 }
0x1746   :  { %3333 = vpow2.f32 %v2605_v18  ;;  %3172 = vmatpush3.bf16.msra.mxu1 %v3169_v35 }
0x1747   :  { %3174 = vmatprep.subr.bf16.mxu1 %v3173_v38 }
0x174a   :  { %3176 = vmatpush3.bf16.msra.mxu1 %v3173_v38 }
0x174b   :  { %3194 = vmatprep.subr.bf16.mxu1 %v3193_v49 }
0x174e   :  { %v3332_v17 = vpop.eup %3331 }
0x174f   :  { %2222 = vrot.lane.b32.xlu0 %v3332_v17, %s3463_s8 }
0x1750   :  { %v3334_v19 = vpop.eup %3333 }
0x1751   :  { %v2216_v22 = vadd.f32 1.0, %v3334_v19 }
0x1753   :  { %3335 = vrcp.f32 %v2216_v22 }
0x175d   :  { %v3336_v23 = vpop.eup %3335 }
0x175e   :  { %v2220_v27 = vmul.f32 %v3336_v23, %v1958_v59  ;;  %v2609_v59 = vld [vmem:[%s4046_s10] ss:$0 sm:$0xff] }
0x17c1   :  { %v2223_v24 = vpop.permute.xlu0 %2222 }
0x17c2   :  { %v2225_v26 = vmul.f32 %v3336_v23, %v2223_v24 }
0x17c4   :  { %2227 = vrot.lane.b32.xlu1 %v2225_v26, %s3464_s1 }
0x1836   :  { %v2228_v30 = vpop.permute.xlu1 %2227 }
0x1837   :  { %v2230_v31 = vadd.f32 %v2228_v30, %v2220_v27 }
0x1839   :  { %3337 = vtanh.f32 %v2230_v31 }
0x1843   :  { %v3338_v32 = vpop.eup %3337 }
0x1844   :  { %2233 = vrot.lane.b32.xlu0 %v3338_v32, %s3463_s8 }
0x18b6   :  { %v2234_v1 = vpop.permute.xlu0 %2233 }
0x18b7   :  { %v2236_v45 = vmul.f32 %v3336_v23, %v2234_v1 }
0x18b9   :  { %2238 = vrot.lane.b32.xlu1 %v2236_v45, %s3464_s1 }
0x192b   :  { %v2239_v21 = vpop.permute.xlu1 %2238 }
0x192c   :  { %2241 = vst.msk [vmem:[#allocation2 + $0xe] sm:$0x3] %vm336_vm4, %v2239_v21 }
0x1933   :  { %v2243_v0 = vld [vmem:[#allocation2 + $0x8] sm:$0xff] }
0x1934   :  { %3005 = vmatmul.mubr.msk.f32.vlgmr.msra.gmra.mrb[22].mxu1 %vm235_vm3, %v2243_v0 }
0x1935   :  { %3196 = vmatpush3.bf16.msra.mxu1 %v3193_v49 }
0x1936   :  { %3198 = vmatprep.subr.bf16.mxu1 %v3197_v58 }
0x1939   :  { %3200 = vmatpush3.bf16.msra.mxu1 %v3197_v58 }
0x1a07   :  { %v3006_v5 = vpop.f32.mrb[22].mxu1 }
0x1a08   :  { %v2333_v51 = vadd.f32 %v3006_v5, %v2606_v50  ;;  %v2327_v52 = vpop.f32.mrb[23].mxu1 }
0x1a09   :  { %v2328_v53 = vadd.f32 %v2606_v50, %v2327_v52 }
0x1a0a   :  { %v2337_v55 = vmax.f32 %v2333_v51, 0.0 }
0x1a0b   :  { %v2336_v54 = vmax.f32 %v2328_v53, 0.0 }
0x1a0d   :  { %3023 = vmatprep.mubr.msk.f32.mxu0 %vm2353_vm5, %v2336_v54 }
0x1a0e   :  { %3024 = vmatmul.mubr.msk.f32.vlgmr.msra.gmra.mrb[24].mxu0 %vm2353_vm5, %v2337_v55 }
0x1ae1   :  { %v3025_v60 = vpop.f32.mrb[24].mxu0 }
0x1ae2   :  { %v2432_v61 = vadd.f32 %v3025_v60, %v2609_v59  ;;  %v2426_v62 = vpop.f32.mrb[25].mxu0 }
0x1ae3   :  { %v2427_v63 = vadd.f32 %v2609_v59, %v2426_v62 }
0x1ae4   :  { %v2436_v4 = vmax.f32 %v2432_v61, 0.0 }
0x1ae5   :  { %v2435_v2 = vmax.f32 %v2427_v63, 0.0 }
0x1ae7   :  { %3034 = vmatprep.mubr.msk.f32.mxu1 %vm235_vm3, %v2435_v2 }
0x1ae8   :  { %3035 = vmatmul.mubr.msk.f32.vlgmr.msra.gmra.mrb[24].mxu1 %vm235_vm3, %v2436_v4 }
0x1bbb   :  { %v3036_v12 = vpop.f32.mrb[24].mxu1 }
0x1bbc   :  { %v2526_v13 = vadd.f32 %v3036_v12, %v2612_v8  ;;  %v2520_v14 = vpop.f32.mrb[25].mxu1 }
0x1bbd   :  { %v2521_v15 = vadd.f32 %v2612_v8, %v2520_v14 }
0x1bbe   :  { %v2549_v16 = vadd.f32 %v2529_v7, %v2526_v13  ;;  %v2551_v17 = vadd.f32 %v2534_v9, %v2526_v13  ;;  %v2553_v18 = vadd.f32 %v2539_v10, %v2526_v13  ;;  %v2555_v19 = vadd.f32 %v2544_v11, %v2526_v13 }
0x1bbf   :  { %v2530_v22 = vadd.f32 %v2529_v7, %v2521_v15  ;;  %v2536_v23 = vadd.f32 %v2534_v9, %v2521_v15  ;;  %v2541_v24 = vadd.f32 %v2539_v10, %v2521_v15  ;;  %v2546_v26 = vadd.f32 %v2544_v11, %v2521_v15 }
0x1bc0   :  { %2550 = vst.msk [vmem:[%s4049_s13 + $0x8] sm:$0x3] %vm2531_vm6, %v2549_v16 }
0x1bc1   :  { %2552 = vst.msk [vmem:[%s4049_s13 + $0x8] sm:$0xc] %vm2537_vm7, %v2551_v17  ;;  %2538 = vst.msk [vmem:[%s4049_s13] sm:$0xc] %vm2537_vm7, %v2536_v23 }
0x1bc2   :  { %2554 = vst.msk [vmem:[%s4049_s13 + $0x8] sm:$0x30] %vm2542_vm8, %v2553_v18  ;;  %2543 = vst.msk [vmem:[%s4049_s13] sm:$0x30] %vm2542_vm8, %v2541_v24 }
0x1bc3   :  { %2556 = vst.msk [vmem:[%s4049_s13 + $0x8] sm:$0xc0] %vm2547_vm9, %v2555_v19  ;;  %2548 = vst.msk [vmem:[%s4049_s13] sm:$0xc0] %vm2547_vm9, %v2546_v26 }
0x1bc4   :  { %2532 = vst.msk [vmem:[%s4049_s13] sm:$0x3] %vm2531_vm6, %v2530_v22 }
0x1bc5   :  { %2561 = vsyncpa [#allocation4], 1 }
0x1bc6   :  { %2562 = vsyncpa [#allocation6], 1 }
0x1bc7   :  { %2563 = vsyncpa [#allocation9], 1 }

</bundles_post_ra>
